<compile_context>
chip_gen: v7x
topology: tpu7x:2x2x1
jax: 0.10.0
libtpu: 0.0.40
codegen_flags: <defaults>
</compile_context>

<pallas_src>
import functools

import jax
import jax.numpy as jnp
from jax.experimental import pallas as pl
from jax.experimental.pallas import tpu as pltpu

NEG_SLOPE = 0.01                      # F.leaky_relu default
_BN_SCALE = (1.0 + 1e-5) ** -0.5
# TODO(synk): _BN_SCALE folds BatchNorm2d(1) with fresh eval stats (mean=0, var=1,
# gamma=1, beta=0); fold the real running stats / affine params for a trained checkpoint.


# ---------------------------------------------------------------------------
# In-kernel helpers (traced inline inside the fused kernel)
# ---------------------------------------------------------------------------
def _leaky(y):
    return jnp.where(y >= 0, y, NEG_SLOPE * y)


def _dot(a, b):
    return jnp.dot(a, b, preferred_element_type=jnp.float32)


def _vcat(parts, axis=0):
    return parts[0] if len(parts) == 1 else jnp.concatenate(parts, axis=axis)


def _channel_gate(a, h, n, w1, b1, w2, b2):
    """CBAM ChannelGate on [h*n, C] rows ((spatial, node)-major); C may be lane-padded."""
    blocks = [a[i * n:(i + 1) * n, :] for i in range(h)]
    acc, mx = blocks[0], blocks[0]
    for blk in blocks[1:]:
        acc = acc + blk
        mx = jnp.maximum(mx, blk)
    pooled = jnp.concatenate([acc * (1.0 / h), mx], axis=0)          # [2n, C]
    hid = jnp.maximum(_dot(pooled, w1) + b1, 0.0)                    # shared MLP: 1 dot/layer
    att = _dot(hid, w2) + b2
    scale = jax.nn.sigmoid(att[:n, :] + att[n:, :])                  # [n, C]
    return a * _vcat([scale] * h, axis=0)


def _spatial_gate(a, h, n, valid_c, sgm):
    """CBAM SpatialGate: channel max/mean, then the 7x7 conv (W==1 -> 7-tap conv along H)
    as ONE banded-matrix matmul (BN scale folded into sgm on the host), then scaling."""
    hn = h * n
    c_tot = a.shape[1]
    if valid_c < c_tot:          # lane padding must not leak into the channel max
        lane = jax.lax.broadcasted_iota(jnp.int32, (1, c_tot), 1)
        mx = jnp.max(jnp.where(lane < valid_c, a, -1e30), axis=1, keepdims=True)
    else:
        mx = jnp.max(a, axis=1, keepdims=True)
    mn = jnp.sum(a, axis=1, keepdims=True) * (1.0 / valid_c)
    parts = [mx, mn]
    pad = sgm.shape[1] - 2 * hn
    if pad > 0:
        parts.append(jnp.zeros((pad, 1), jnp.float32))
    gate = jax.nn.sigmoid(_dot(sgm, jnp.concatenate(parts, axis=0)))  # [hn, 1]
    return a * gate


# ---------------------------------------------------------------------------
# The fused whole-forward kernel
# ---------------------------------------------------------------------------
def _fused_forward_kernel(xf_ref, xr_ref, src_ref, dst_ref, w128_ref, w256_ref,
                          eps_ref, o_ref, *, n, h0, off128, off256):
    ha, hb, hc = h0 // 2, h0 // 4, h0 // 8

    def w1s(name):
        s, r = off128[name]
        return w128_ref[s:s + r, :]

    def w2s(name):
        s, r = off256[name]
        return w256_ref[s:s + r, :]

    # ---- conv2Da, x-channel half (independent of the GIN chain -> hoisted) ---------
    xf = xf_ref[...]                                                  # [n, 2*h0]
    kx = 2 * h0
    s_wxf = off128["wxf"][0]
    axf = _vcat([_dot(xf, w128_ref[s_wxf + kx * ho: s_wxf + kx * (ho + 1), :])
                 for ho in range(ha)], axis=0)                        # [ha*n, 128]

    # ---- adjacency from edge_index (one-hot matmuls; replaces the XLA scatter) -----
    e = src_ref.shape[0]
    src_oh = jnp.where(src_ref[...] == jax.lax.broadcasted_iota(jnp.int32, (e, n), 1),
                       1.0, 0.0)                                      # [E, n]
    dst_oh = jnp.where(dst_ref[...] == jax.lax.broadcasted_iota(jnp.int32, (n, e), 0),
                       1.0, 0.0)                                      # [n, E]
    adj = _dot(dst_oh, src_oh)                                        # [n, n]

    # ---- GIN branch: fc -> aggregate -> GINN l1/l2 -> outer leaky -------------------
    x1 = _leaky(_dot(xr_ref[...], w1s("fc_w")) + w1s("fc_b"))         # [n, 128] (64 valid)
    x1 = (1.0 + eps_ref[0, 0]) * x1 + _dot(adj, x1)                   # GIN aggregation
    x1 = _leaky(_dot(x1, w1s("l1_w")) + w1s("l1_b"))
    x1 = _leaky(_dot(x1, w1s("l2_w")) + w1s("l2_b"))
    x1 = _leaky(x1)          # outer leaky in NetGINConv.forward (double on purpose)

    # ---- conv2Da, GIN-channel half + bias, then CBAM1 -------------------------------
    s_wg = off128["wgin"][0]
    agin = _vcat([_dot(x1, w128_ref[s_wg + 128 * ho: s_wg + 128 * (ho + 1), :])
                  for ho in range(ha)], axis=0)
    a = _leaky(axf + agin + w1s("ba"))                                # [ha*n, 128]; 64 valid
    a = _channel_gate(a, ha, n, w1s("cg1_w1"), w1s("cg1_b1"), w1s("cg1_w2"), w1s("cg1_b2"))
    a = _spatial_gate(a, ha, n, 64, w1s("sgm1"))

    # ---- conv2Db (2,1)/s2: two accumulating K-block dots, no lane concat ------------
    a_ev = _vcat([a[(2 * i) * n:(2 * i + 1) * n, :] for i in range(hb)], axis=0)
    a_od = _vcat([a[(2 * i + 1) * n:(2 * i + 2) * n, :] for i in range(hb)], axis=0)
    b = _leaky(_dot(a_ev, w1s("wb_hi")) + _dot(a_od, w1s("wb_lo")) + w1s("bb"))
    b = _channel_gate(b, hb, n, w1s("cg2_w1"), w1s("cg2_b1"), w1s("cg2_w2"), w1s("cg2_b2"))
    b = _spatial_gate(b, hb, n, 128, w1s("sgm2"))

    # ---- conv2Dc (2,1)/s2 + CBAM3 ----------------------------------------------------
    b_ev = _vcat([b[(2 * i) * n:(2 * i + 1) * n, :] for i in range(hc)], axis=0)
    b_od = _vcat([b[(2 * i + 1) * n:(2 * i + 2) * n, :] for i in range(hc)], axis=0)
    c = _leaky(_dot(b_ev, w2s("wc_hi")) + _dot(b_od, w2s("wc_lo")) + w2s("bc"))   # [hc*n, 256]
    c = _channel_gate(c, hc, n, w1s("cg3_w1"), w1s("cg3_b1"), w2s("cg3_w2"), w2s("cg3_b2"))
    c = _spatial_gate(c, hc, n, 256, w1s("sgm3"))

    # ---- conv2Dd 1x1 epilogue (lane-dense [hc*n, 128] store) -------------------------
    o_ref[...] = _leaky(_dot(c, w1s("wd")) + w1s("bd")).astype(o_ref.dtype)


# ---------------------------------------------------------------------------
# Host-side wrapper
# ---------------------------------------------------------------------------
def net_gin_conv_forward(params, x, x_real, edge_index, *,
                         num_nodes, input_steps, output_size, offs):
    """Mirrors NetGINConv.forward(x, x_real, edge_index). x: [N, 1, input_steps, 2]."""
    n, h0 = num_nodes, input_steps
    assert h0 % 8 == 0, "conv trunk halves H three times"
    hc = h0 // 8

    x_flat = jnp.asarray(x, jnp.float32).reshape(n, 2 * h0)
    xr = jnp.asarray(x_real, jnp.float32)
    e = edge_index.shape[1]
    src_col = jnp.asarray(edge_index[0], jnp.int32).reshape(e, 1)
    dst_row = jnp.asarray(edge_index[1], jnp.int32).reshape(1, e)

    vmem = pl.BlockSpec(memory_space=pltpu.MemorySpace.VMEM)
    smem = pl.BlockSpec(memory_space=pltpu.MemorySpace.SMEM)
    kernel = functools.partial(_fused_forward_kernel, n=n, h0=h0,
                               off128=offs["w128"], off256=offs["w256"])
    out = pl.pallas_call(
        kernel,
        out_shape=jax.ShapeDtypeStruct((hc * n, 128), jnp.float32),
        in_specs=[vmem] * 6 + [smem],
        out_specs=vmem,
    )(x_flat, xr, src_col, dst_row, params["w128"], params["w256"], params["eps"])

    out = out[:, :output_size].reshape(hc, n, output_size)   # rows are (spatial, node)-major
    return jnp.transpose(out, (1, 2, 0))[:, :, :, None]      # NCHW [N, output_size, hc, 1]


# ---------------------------------------------------------------------------
# Parameters: raw (PyTorch layouts) + one-time host-side packing (hoisted)
# ---------------------------------------------------------------------------
def init_params(key, num_features, output_size):
    """Deterministic random params in PyTorch layouts (Linear: [out,in], Conv: [Cout,Cin,kh,kw])."""
    input_steps = num_features // 2
    gin_in = input_steps * 2 * 2 * 2          # num_features * 2 * feature_expansion
    keys = iter(jax.random.split(key, 40))

    def w(shape, scale=0.1):
        return jax.random.normal(next(keys), shape, jnp.float32) * scale

    def cbam_p(ch):
        cr = ch // 16
        return {"cg_l1_w": w((cr, ch)), "cg_l1_b": w((cr,), 0.01),
                "cg_l2_w": w((ch, cr)), "cg_l2_b": w((ch,), 0.01),
                "sg_w": w((1, 2, 7, 7))}   # BasicConv(2,1,7) weight, bias=False

    return {
        "fc_w": w((gin_in, num_features * 2)), "fc_b": w((gin_in,), 0.01),
        "gin_l1_w": w((gin_in // 2, gin_in)), "gin_l1_b": w((gin_in // 2,), 0.01),
        "gin_l2_w": w((gin_in // 4, gin_in // 2)), "gin_l2_b": w((gin_in // 4,), 0.01),
        "convA_w": w((64, 2, 2, 2)), "convA_b": w((64,), 0.01),
        "convB_w": w((128, 64, 2, 1)), "convB_b": w((128,), 0.01),
        "convC_w": w((256, 128, 2, 1)), "convC_b": w((256,), 0.01),
        "convD_w": w((output_size, 256, 1, 1)), "convD_b": w((output_size,), 0.01),
        "cbam1": cbam_p(64), "cbam2": cbam_p(128), "cbam3": cbam_p(256),
    }


def _pack(entries, width):
    """Pack (name, [r, c<=width]) arrays into one [R, width] slab; 8-row-aligned segments."""
    parts, offs, off = [], {}, 0
    for name, arr in entries:
        arr = jnp.asarray(arr, jnp.float32)
        r, cdim = arr.shape
        assert cdim <= width, (name, cdim, width)
        r8 = ((r + 7) // 8) * 8
        parts.append(jnp.pad(arr, ((0, r8 - r), (0, width - cdim))))
        offs[name] = (off, r)
        off += r8
    return jnp.concatenate(parts, axis=0), offs


def prepare_params(raw, output_size, num_nodes, input_steps):
    """One-time weight preprocessing: transposes, K padding, block-structured conv weights,
    banded spatial-gate matrices, and packing into two flat VMEM slabs."""
    n, h0 = num_nodes, input_steps
    assert h0 % 8 == 0 and 8 * h0 <= 128 and output_size <= 128
    ha, hb, hc = h0 // 2, h0 // 4, h0 // 8
    assert 2 * ha * n <= 128, "spatial-gate tap matrix must fit the 128-wide slab"
    f = lambda a: jnp.asarray(a, jnp.float32)
    row = lambda b: f(b).reshape(1, -1)

    def kpad(wm, k):               # zero-pad the contraction (row) dim up to k
        wm = f(wm)
        return jnp.pad(wm, ((0, k - wm.shape[0]), (0, 0)))

    # conv2Da: fold the (cin, kh, kw) spatial gather into block-structured weights.
    wa = f(raw["convA_w"]).reshape(64, 8).T               # [8, 64], rows = (cin, kh, kw)
    wxf_base, wgin_base = wa[:4, :], wa[4:, :]            # cin=0 (x), cin=1 (GIN branch)
    kx = 2 * h0
    wxf = jnp.zeros((ha * kx, 64), jnp.float32)           # per-ho [kx, 64] blocks
    wgin = jnp.zeros((ha * 128, 64), jnp.float32)         # per-ho [128, 64] blocks (K padded)
    for ho in range(ha):
        wxf = wxf.at[ho * kx + 4 * ho: ho * kx + 4 * ho + 4, :].set(wxf_base)
        wgin = wgin.at[ho * 128 + 4 * ho: ho * 128 + 4 * ho + 4, :].set(wgin_base)

    # conv2Db / conv2Dc: split kh=0 / kh=1 taps into two accumulating K-blocks.
    wbt = f(raw["convB_w"])[:, :, :, 0]                   # [128, 64, 2]
    wct = f(raw["convC_w"])[:, :, :, 0]                   # [256, 128, 2]
    wb_hi, wb_lo = kpad(wbt[:, :, 0].T, 128), kpad(wbt[:, :, 1].T, 128)
    wc_hi, wc_lo = wct[:, :, 0].T, wct[:, :, 1].T         # [128, 256] each

    wd = f(raw["convD_w"]).reshape(output_size, 256).T    # [256, output_size]

    def cg_prep(c, k1):
        return (kpad(f(c["cg_l1_w"]).T, k1), row(c["cg_l1_b"]),
                kpad(f(c["cg_l2_w"]).T, 128), row(c["cg_l2_b"]))

    c1w1, c1b1, c1w2, c1b2 = cg_prep(raw["cbam1"], 128)
    c2w1, c2b1, c2w2, c2b2 = cg_prep(raw["cbam2"], 128)
    c3w1, c3b1, c3w2, c3b2 = cg_prep(raw["cbam3"], 256)

    def sg_mat(c, h):
        # Banded identity-block tap matrix: one tiny matmul replaces the per-(ho, dh)
        # SMEM-scalar FMA loop.  Only the center kw column of the 7x7 kernel sees data
        # (W==1) and the BatchNorm2d(1) eval scale is folded in.
        taps = f(c["sg_w"])[0, :, :, 3] * _BN_SCALE       # [2, 7]; row0 = max, row1 = mean
        hn = h * n
        m = jnp.zeros((hn, 2 * hn), jnp.float32)
        eye = jnp.eye(n, dtype=jnp.float32)
        for ho in range(h):
            for hi in range(h):
                d = hi - ho
                if abs(d) <= 3:
                    m = m.at[ho * n:(ho + 1) * n, hi * n:(hi + 1) * n].set(taps[0, d + 3] * eye)
                    m = m.at[ho * n:(ho + 1) * n, hn + hi * n:hn + (hi + 1) * n].set(taps[1, d + 3] * eye)
        return m

    e128 = [
        ("fc_w", f(raw["fc_w"]).T), ("fc_b", row(raw["fc_b"])),
        ("l1_w", kpad(f(raw["gin_l1_w"]).T, 128)), ("l1_b", row(raw["gin_l1_b"])),
        ("l2_w", kpad(f(raw["gin_l2_w"]).T, 128)), ("l2_b", row(raw["gin_l2_b"])),
        ("wxf", wxf), ("wgin", wgin), ("ba", row(raw["convA_b"])),
        ("cg1_w1", c1w1), ("cg1_b1", c1b1), ("cg1_w2", c1w2), ("cg1_b2", c1b2),
        ("sgm1", sg_mat(raw["cbam1"], ha)),
        ("wb_hi", wb_hi), ("wb_lo", wb_lo), ("bb", row(raw["convB_b"])),
        ("cg2_w1", c2w1), ("cg2_b1", c2b1), ("cg2_w2", c2w2), ("cg2_b2", c2b2),
        ("sgm2", sg_mat(raw["cbam2"], hb)),
        ("cg3_w1", c3w1), ("cg3_b1", c3b1),
        ("sgm3", sg_mat(raw["cbam3"], hc)),
        ("wd", wd), ("bd", row(raw["convD_b"])),
    ]
    e256 = [
        ("wc_hi", wc_hi), ("wc_lo", wc_lo), ("bc", row(raw["convC_b"])),
        ("cg3_w2", c3w2), ("cg3_b2", c3b2),
    ]
    w128, off128 = _pack(e128, 128)
    w256, off256 = _pack(e256, 256)

    # TODO(synk): GINConv's second network nn2 is unused (its role is undefined in the
    # repo's custom GINConv), so it is not materialized here.
    params = {"w128": w128, "w256": w256,
              "eps": jnp.zeros((1, 1), jnp.float32)}      # GINConv train_eps initial value
    offs = {"w128": off128, "w256": off256}
    return params, offs


# ---------------------------------------------------------------------------
if __name__ == "__main__":
    num_features = 16          # -> input_steps = 8, num_cords = 2
    output_size = 5
    num_nodes = 8              # graph nodes / batch
    input_steps = num_features // 2

    key = jax.random.PRNGKey(0)
    k_p, k_x, k_xr, k_e = jax.random.split(key, 4)

    raw_params = init_params(k_p, num_features, output_size)
    params, offs = prepare_params(raw_params, output_size, num_nodes, input_steps)

    x = jax.random.normal(k_x, (num_nodes, 1, input_steps, 2), jnp.float32)       # NCHW
    x_real = jax.random.normal(k_xr, (num_nodes, num_features * 2), jnp.float32)  # [N, 32]
    edge_index = jax.random.randint(k_e, (2, 16), 0, num_nodes)                   # [2, E]

    fwd = jax.jit(functools.partial(
        net_gin_conv_forward, num_nodes=num_nodes, input_steps=input_steps,
        output_size=output_size, offs=offs))

    out = jax.block_until_ready(fwd(params, x, x_real, edge_index))

    assert out.shape == (num_nodes, output_size, input_steps // 8, 1), out.shape
    assert bool(jnp.all(jnp.isfinite(out)))
    print("KERNEL_OK")
</pallas_src>

<mosaic_0001>
module attributes {stable_mosaic.version = 11 : i64} {
  func.func @_fused_forward_kernel(%arg0: memref<8x16xf32, #tpu.memory_space<vmem>>, %arg1: memref<8x32xf32, #tpu.memory_space<vmem>>, %arg2: memref<16x1xi32, #tpu.memory_space<vmem>>, %arg3: memref<1x16xi32, #tpu.memory_space<vmem>>, %arg4: memref<2288x128xf32, #tpu.memory_space<vmem>>, %arg5: memref<400x256xf32, #tpu.memory_space<vmem>>, %arg6: memref<1x1xf32, #tpu.memory_space<smem>>, %arg7: memref<8x128xf32, #tpu.memory_space<vmem>>) attributes {dimension_semantics = [], scalar_prefetch = 0 : i64, scratch_operands = 0 : i64, tpu.core_type = #tpu.core_type<tc>} {
    %c0 = arith.constant 0 : index
    %c0_0 = arith.constant 0 : index
    %0 = vector.load %arg0[%c0, %c0_0] : memref<8x16xf32, #tpu.memory_space<vmem>>, vector<8x16xf32>
    %c312 = arith.constant 312 : index
    %c0_1 = arith.constant 0 : index
    %1 = vector.load %arg4[%c312, %c0_1] : memref<2288x128xf32, #tpu.memory_space<vmem>>, vector<16x128xf32>
    %cst = arith.constant dense<0.000000e+00> : vector<8x128xf32>
    %2 = tpu.matmul %0, %1, %cst {dimension_numbers = #tpu.dot_dimension_numbers<[1], [0], [0], [1], [0, 0, 1, 1], [], []>} : vector<8x16xf32>, vector<16x128xf32>, vector<8x128xf32> -> vector<8x128xf32>
    %c328 = arith.constant 328 : index
    %c0_2 = arith.constant 0 : index
    %3 = vector.load %arg4[%c328, %c0_2] : memref<2288x128xf32, #tpu.memory_space<vmem>>, vector<16x128xf32>
    %cst_3 = arith.constant dense<0.000000e+00> : vector<8x128xf32>
    %4 = tpu.matmul %0, %3, %cst_3 {dimension_numbers = #tpu.dot_dimension_numbers<[1], [0], [0], [1], [0, 0, 1, 1], [], []>} : vector<8x16xf32>, vector<16x128xf32>, vector<8x128xf32> -> vector<8x128xf32>
    %c344 = arith.constant 344 : index
    %c0_4 = arith.constant 0 : index
    %5 = vector.load %arg4[%c344, %c0_4] : memref<2288x128xf32, #tpu.memory_space<vmem>>, vector<16x128xf32>
    %cst_5 = arith.constant dense<0.000000e+00> : vector<8x128xf32>
    %6 = tpu.matmul %0, %5, %cst_5 {dimension_numbers = #tpu.dot_dimension_numbers<[1], [0], [0], [1], [0, 0, 1, 1], [], []>} : vector<8x16xf32>, vector<16x128xf32>, vector<8x128xf32> -> vector<8x128xf32>
    %c360 = arith.constant 360 : index
    %c0_6 = arith.constant 0 : index
    %7 = vector.load %arg4[%c360, %c0_6] : memref<2288x128xf32, #tpu.memory_space<vmem>>, vector<16x128xf32>
    %cst_7 = arith.constant dense<0.000000e+00> : vector<8x128xf32>
    %8 = tpu.matmul %0, %7, %cst_7 {dimension_numbers = #tpu.dot_dimension_numbers<[1], [0], [0], [1], [0, 0, 1, 1], [], []>} : vector<8x16xf32>, vector<16x128xf32>, vector<8x128xf32> -> vector<8x128xf32>
    %9 = tpu.concatenate %2, %4, %6, %8 in 0 : vector<8x128xf32>, vector<8x128xf32>, vector<8x128xf32>, vector<8x128xf32> -> vector<32x128xf32>
    %c0_8 = arith.constant 0 : index
    %c0_9 = arith.constant 0 : index
    %10 = vector.load %arg2[%c0_8, %c0_9] : memref<16x1xi32, #tpu.memory_space<vmem>>, vector<16x1xi32>
    %11 = tpu.iota {dimensions = array<i32: 1>} : vector<16x8xi32>
    %12 = vector.broadcast %10 : vector<16x1xi32> to vector<16x8xi32>
    %13 = arith.cmpi eq, %12, %11 : vector<16x8xi32>
    %cst_10 = arith.constant 1.000000e+00 : f32
    %cst_11 = arith.constant 0.000000e+00 : f32
    %14 = vector.broadcast %cst_10 : f32 to vector<16x8xf32>
    %15 = vector.broadcast %cst_11 : f32 to vector<16x8xf32>
    %16 = arith.select %13, %14, %15 : vector<16x8xi1>, vector<16x8xf32>
    %c0_12 = arith.constant 0 : index
    %c0_13 = arith.constant 0 : index
    %17 = vector.load %arg3[%c0_12, %c0_13] : memref<1x16xi32, #tpu.memory_space<vmem>>, vector<1x16xi32>
    %18 = tpu.iota {dimensions = array<i32: 0>} : vector<8x16xi32>
    %19 = vector.broadcast %17 : vector<1x16xi32> to vector<8x16xi32>
    %20 = arith.cmpi eq, %19, %18 : vector<8x16xi32>
    %cst_14 = arith.constant 1.000000e+00 : f32
    %cst_15 = arith.constant 0.000000e+00 : f32
    %21 = vector.broadcast %cst_14 : f32 to vector<8x16xf32>
    %22 = vector.broadcast %cst_15 : f32 to vector<8x16xf32>
    %23 = arith.select %20, %21, %22 : vector<8x16xi1>, vector<8x16xf32>
    %cst_16 = arith.constant dense<0.000000e+00> : vector<8x8xf32>
    %24 = tpu.matmul %23, %16, %cst_16 {dimension_numbers = #tpu.dot_dimension_numbers<[1], [0], [0], [1], [0, 0, 1, 1], [], []>} : vector<8x16xf32>, vector<16x8xf32>, vector<8x8xf32> -> vector<8x8xf32>
    %c0_17 = arith.constant 0 : index
    %c0_18 = arith.constant 0 : index
    %25 = vector.load %arg1[%c0_17, %c0_18] : memref<8x32xf32, #tpu.memory_space<vmem>>, vector<8x32xf32>
    %c0_19 = arith.constant 0 : index
    %c0_20 = arith.constant 0 : index
    %26 = vector.load %arg4[%c0_19, %c0_20] : memref<2288x128xf32, #tpu.memory_space<vmem>>, vector<32x128xf32>
    %cst_21 = arith.constant dense<0.000000e+00> : vector<8x128xf32>
    %27 = tpu.matmul %25, %26, %cst_21 {dimension_numbers = #tpu.dot_dimension_numbers<[1], [0], [0], [1], [0, 0, 1, 1], [], []>} : vector<8x32xf32>, vector<32x128xf32>, vector<8x128xf32> -> vector<8x128xf32>
    %c32 = arith.constant 32 : index
    %c0_22 = arith.constant 0 : index
    %28 = vector.load %arg4[%c32, %c0_22] : memref<2288x128xf32, #tpu.memory_space<vmem>>, vector<1x128xf32>
    %29 = vector.broadcast %28 : vector<1x128xf32> to vector<8x128xf32>
    %30 = arith.addf %27, %29 : vector<8x128xf32>
    %cst_23 = arith.constant 0.000000e+00 : f32
    %31 = vector.broadcast %cst_23 : f32 to vector<8x128xf32>
    %32 = arith.cmpf oge, %30, %31 : vector<8x128xf32>
    %cst_24 = arith.constant 0.00999999977 : f32
    %33 = vector.broadcast %cst_24 : f32 to vector<8x128xf32>
    %34 = arith.mulf %33, %30 : vector<8x128xf32>
    %35 = arith.select %32, %30, %34 : vector<8x128xi1>, vector<8x128xf32>
    %c0_25 = arith.constant 0 : index
    %c0_26 = arith.constant 0 : index
    %36 = memref.load %arg6[%c0_25, %c0_26] : memref<1x1xf32, #tpu.memory_space<smem>>
    %cst_27 = arith.constant 1.000000e+00 : f32
    %37 = arith.addf %cst_27, %36 : f32
    %38 = vector.broadcast %37 : f32 to vector<8x128xf32>
    %39 = arith.mulf %38, %35 : vector<8x128xf32>
    %cst_28 = arith.constant dense<0.000000e+00> : vector<8x128xf32>
    %40 = tpu.matmul %24, %35, %cst_28 {dimension_numbers = #tpu.dot_dimension_numbers<[1], [0], [0], [1], [0, 0, 1, 1], [], []>} : vector<8x8xf32>, vector<8x128xf32>, vector<8x128xf32> -> vector<8x128xf32>
    %41 = arith.addf %39, %40 : vector<8x128xf32>
    %c40 = arith.constant 40 : index
    %c0_29 = arith.constant 0 : index
    %42 = vector.load %arg4[%c40, %c0_29] : memref<2288x128xf32, #tpu.memory_space<vmem>>, vector<128x128xf32>
    %cst_30 = arith.constant dense<0.000000e+00> : vector<8x128xf32>
    %43 = tpu.matmul %41, %42, %cst_30 {dimension_numbers = #tpu.dot_dimension_numbers<[1], [0], [0], [1], [0, 0, 1, 1], [], []>} : vector<8x128xf32>, vector<128x128xf32>, vector<8x128xf32> -> vector<8x128xf32>
    %c168 = arith.constant 168 : index
    %c0_31 = arith.constant 0 : index
    %44 = vector.load %arg4[%c168, %c0_31] : memref<2288x128xf32, #tpu.memory_space<vmem>>, vector<1x128xf32>
    %45 = vector.broadcast %44 : vector<1x128xf32> to vector<8x128xf32>
    %46 = arith.addf %43, %45 : vector<8x128xf32>
    %cst_32 = arith.constant 0.000000e+00 : f32
    %47 = vector.broadcast %cst_32 : f32 to vector<8x128xf32>
    %48 = arith.cmpf oge, %46, %47 : vector<8x128xf32>
    %cst_33 = arith.constant 0.00999999977 : f32
    %49 = vector.broadcast %cst_33 : f32 to vector<8x128xf32>
    %50 = arith.mulf %49, %46 : vector<8x128xf32>
    %51 = arith.select %48, %46, %50 : vector<8x128xi1>, vector<8x128xf32>
    %c176 = arith.constant 176 : index
    %c0_34 = arith.constant 0 : index
    %52 = vector.load %arg4[%c176, %c0_34] : memref<2288x128xf32, #tpu.memory_space<vmem>>, vector<128x128xf32>
    %cst_35 = arith.constant dense<0.000000e+00> : vector<8x128xf32>
    %53 = tpu.matmul %51, %52, %cst_35 {dimension_numbers = #tpu.dot_dimension_numbers<[1], [0], [0], [1], [0, 0, 1, 1], [], []>} : vector<8x128xf32>, vector<128x128xf32>, vector<8x128xf32> -> vector<8x128xf32>
    %c304 = arith.constant 304 : index
    %c0_36 = arith.constant 0 : index
    %54 = vector.load %arg4[%c304, %c0_36] : memref<2288x128xf32, #tpu.memory_space<vmem>>, vector<1x128xf32>
    %55 = vector.broadcast %54 : vector<1x128xf32> to vector<8x128xf32>
    %56 = arith.addf %53, %55 : vector<8x128xf32>
    %cst_37 = arith.constant 0.000000e+00 : f32
    %57 = vector.broadcast %cst_37 : f32 to vector<8x128xf32>
    %58 = arith.cmpf oge, %56, %57 : vector<8x128xf32>
    %cst_38 = arith.constant 0.00999999977 : f32
    %59 = vector.broadcast %cst_38 : f32 to vector<8x128xf32>
    %60 = arith.mulf %59, %56 : vector<8x128xf32>
    %61 = arith.select %58, %56, %60 : vector<8x128xi1>, vector<8x128xf32>
    %cst_39 = arith.constant 0.000000e+00 : f32
    %62 = vector.broadcast %cst_39 : f32 to vector<8x128xf32>
    %63 = arith.cmpf oge, %61, %62 : vector<8x128xf32>
    %cst_40 = arith.constant 0.00999999977 : f32
    %64 = vector.broadcast %cst_40 : f32 to vector<8x128xf32>
    %65 = arith.mulf %64, %61 : vector<8x128xf32>
    %66 = arith.select %63, %61, %65 : vector<8x128xi1>, vector<8x128xf32>
    %c376 = arith.constant 376 : index
    %c0_41 = arith.constant 0 : index
    %67 = vector.load %arg4[%c376, %c0_41] : memref<2288x128xf32, #tpu.memory_space<vmem>>, vector<128x128xf32>
    %cst_42 = arith.constant dense<0.000000e+00> : vector<8x128xf32>
    %68 = tpu.matmul %66, %67, %cst_42 {dimension_numbers = #tpu.dot_dimension_numbers<[1], [0], [0], [1], [0, 0, 1, 1], [], []>} : vector<8x128xf32>, vector<128x128xf32>, vector<8x128xf32> -> vector<8x128xf32>
    %c504 = arith.constant 504 : index
    %c0_43 = arith.constant 0 : index
    %69 = vector.load %arg4[%c504, %c0_43] : memref<2288x128xf32, #tpu.memory_space<vmem>>, vector<128x128xf32>
    %cst_44 = arith.constant dense<0.000000e+00> : vector<8x128xf32>
    %70 = tpu.matmul %66, %69, %cst_44 {dimension_numbers = #tpu.dot_dimension_numbers<[1], [0], [0], [1], [0, 0, 1, 1], [], []>} : vector<8x128xf32>, vector<128x128xf32>, vector<8x128xf32> -> vector<8x128xf32>
    %c632 = arith.constant 632 : index
    %c0_45 = arith.constant 0 : index
    %71 = vector.load %arg4[%c632, %c0_45] : memref<2288x128xf32, #tpu.memory_space<vmem>>, vector<128x128xf32>
    %cst_46 = arith.constant dense<0.000000e+00> : vector<8x128xf32>
    %72 = tpu.matmul %66, %71, %cst_46 {dimension_numbers = #tpu.dot_dimension_numbers<[1], [0], [0], [1], [0, 0, 1, 1], [], []>} : vector<8x128xf32>, vector<128x128xf32>, vector<8x128xf32> -> vector<8x128xf32>
    %c760 = arith.constant 760 : index
    %c0_47 = arith.constant 0 : index
    %73 = vector.load %arg4[%c760, %c0_47] : memref<2288x128xf32, #tpu.memory_space<vmem>>, vector<128x128xf32>
    %cst_48 = arith.constant dense<0.000000e+00> : vector<8x128xf32>
    %74 = tpu.matmul %66, %73, %cst_48 {dimension_numbers = #tpu.dot_dimension_numbers<[1], [0], [0], [1], [0, 0, 1, 1], [], []>} : vector<8x128xf32>, vector<128x128xf32>, vector<8x128xf32> -> vector<8x128xf32>
    %75 = tpu.concatenate %68, %70, %72, %74 in 0 : vector<8x128xf32>, vector<8x128xf32>, vector<8x128xf32>, vector<8x128xf32> -> vector<32x128xf32>
    %76 = arith.addf %9, %75 : vector<32x128xf32>
    %c888 = arith.constant 888 : index
    %c0_49 = arith.constant 0 : index
    %77 = vector.load %arg4[%c888, %c0_49] : memref<2288x128xf32, #tpu.memory_space<vmem>>, vector<1x128xf32>
    %78 = vector.broadcast %77 : vector<1x128xf32> to vector<32x128xf32>
    %79 = arith.addf %76, %78 : vector<32x128xf32>
    %cst_50 = arith.constant 0.000000e+00 : f32
    %80 = vector.broadcast %cst_50 : f32 to vector<32x128xf32>
    %81 = arith.cmpf oge, %79, %80 : vector<32x128xf32>
    %cst_51 = arith.constant 0.00999999977 : f32
    %82 = vector.broadcast %cst_51 : f32 to vector<32x128xf32>
    %83 = arith.mulf %82, %79 : vector<32x128xf32>
    %84 = arith.select %81, %79, %83 : vector<32x128xi1>, vector<32x128xf32>
    %c896 = arith.constant 896 : index
    %c0_52 = arith.constant 0 : index
    %85 = vector.load %arg4[%c896, %c0_52] : memref<2288x128xf32, #tpu.memory_space<vmem>>, vector<128x128xf32>
    %c1024 = arith.constant 1024 : index
    %c0_53 = arith.constant 0 : index
    %86 = vector.load %arg4[%c1024, %c0_53] : memref<2288x128xf32, #tpu.memory_space<vmem>>, vector<1x128xf32>
    %c1032 = arith.constant 1032 : index
    %c0_54 = arith.constant 0 : index
    %87 = vector.load %arg4[%c1032, %c0_54] : memref<2288x128xf32, #tpu.memory_space<vmem>>, vector<128x128xf32>
    %c1160 = arith.constant 1160 : index
    %c0_55 = arith.constant 0 : index
    %88 = vector.load %arg4[%c1160, %c0_55] : memref<2288x128xf32, #tpu.memory_space<vmem>>, vector<1x128xf32>
    %89 = vector.extract_strided_slice %84 {offsets = [0, 0], sizes = [8, 128], strides = [1, 1]} : vector<32x128xf32> to vector<8x128xf32>
    %90 = vector.extract_strided_slice %84 {offsets = [8, 0], sizes = [8, 128], strides = [1, 1]} : vector<32x128xf32> to vector<8x128xf32>
    %91 = vector.extract_strided_slice %84 {offsets = [16, 0], sizes = [8, 128], strides = [1, 1]} : vector<32x128xf32> to vector<8x128xf32>
    %92 = vector.extract_strided_slice %84 {offsets = [24, 0], sizes = [8, 128], strides = [1, 1]} : vector<32x128xf32> to vector<8x128xf32>
    %93 = arith.addf %89, %90 : vector<8x128xf32>
    %94 = arith.maximumf %89, %90 : vector<8x128xf32>
    %95 = arith.addf %93, %91 : vector<8x128xf32>
    %96 = arith.maximumf %94, %91 : vector<8x128xf32>
    %97 = arith.addf %95, %92 : vector<8x128xf32>
    %98 = arith.maximumf %96, %92 : vector<8x128xf32>
    %cst_56 = arith.constant 2.500000e-01 : f32
    %99 = vector.broadcast %cst_56 : f32 to vector<8x128xf32>
    %100 = arith.mulf %97, %99 : vector<8x128xf32>
    %101 = tpu.concatenate %100, %98 in 0 : vector<8x128xf32>, vector<8x128xf32> -> vector<16x128xf32>
    %cst_57 = arith.constant dense<0.000000e+00> : vector<16x128xf32>
    %102 = tpu.matmul %101, %85, %cst_57 {dimension_numbers = #tpu.dot_dimension_numbers<[1], [0], [0], [1], [0, 0, 1, 1], [], []>} : vector<16x128xf32>, vector<128x128xf32>, vector<16x128xf32> -> vector<16x128xf32>
    %103 = vector.broadcast %86 : vector<1x128xf32> to vector<16x128xf32>
    %104 = arith.addf %102, %103 : vector<16x128xf32>
    %cst_58 = arith.constant 0.000000e+00 : f32
    %105 = vector.broadcast %cst_58 : f32 to vector<16x128xf32>
    %106 = arith.maximumf %104, %105 : vector<16x128xf32>
    %cst_59 = arith.constant dense<0.000000e+00> : vector<16x128xf32>
    %107 = tpu.matmul %106, %87, %cst_59 {dimension_numbers = #tpu.dot_dimension_numbers<[1], [0], [0], [1], [0, 0, 1, 1], [], []>} : vector<16x128xf32>, vector<128x128xf32>, vector<16x128xf32> -> vector<16x128xf32>
    %108 = vector.broadcast %88 : vector<1x128xf32> to vector<16x128xf32>
    %109 = arith.addf %107, %108 : vector<16x128xf32>
    %110 = vector.extract_strided_slice %109 {offsets = [0, 0], sizes = [8, 128], strides = [1, 1]} : vector<16x128xf32> to vector<8x128xf32>
    %111 = vector.extract_strided_slice %109 {offsets = [8, 0], sizes = [8, 128], strides = [1, 1]} : vector<16x128xf32> to vector<8x128xf32>
    %112 = arith.addf %110, %111 : vector<8x128xf32>
    %113 = arith.negf %112 : vector<8x128xf32>
    %114 = math.exp %113 : vector<8x128xf32>
    %cst_60 = arith.constant 1.000000e+00 : f32
    %115 = vector.broadcast %cst_60 : f32 to vector<8x128xf32>
    %116 = arith.addf %115, %114 : vector<8x128xf32>
    %117 = arith.divf %115, %116 : vector<8x128xf32>
    %118 = tpu.concatenate %117, %117, %117, %117 in 0 : vector<8x128xf32>, vector<8x128xf32>, vector<8x128xf32>, vector<8x128xf32> -> vector<32x128xf32>
    %119 = arith.mulf %84, %118 : vector<32x128xf32>
    %c1168 = arith.constant 1168 : index
    %c0_61 = arith.constant 0 : index
    %120 = vector.load %arg4[%c1168, %c0_61] : memref<2288x128xf32, #tpu.memory_space<vmem>>, vector<32x128xf32>
    %121 = tpu.iota {dimensions = array<i32: 1>} : vector<1x128xi32>
    %c64_i32 = arith.constant 64 : i32
    %122 = vector.broadcast %c64_i32 : i32 to vector<1x128xi32>
    %123 = arith.cmpi slt, %121, %122 : vector<1x128xi32>
    %cst_62 = arith.constant -1.000000e+30 : f32
    %124 = vector.shape_cast %123 : vector<1x128xi1> to vector<1x128xi1>
    %125 = vector.broadcast %124 : vector<1x128xi1> to vector<32x128xi1>
    %126 = vector.broadcast %cst_62 : f32 to vector<32x128xf32>
    %127 = arith.select %125, %119, %126 : vector<32x128xi1>, vector<32x128xf32>
    %cst_63 = arith.constant dense<0xFF800000> : vector<32xf32>
    %128 = vector.multi_reduction <maximumf>, %127, %cst_63 [1] : vector<32x128xf32> to vector<32xf32>
    %129 = vector.shape_cast %128 : vector<32xf32> to vector<32x1xf32>
    %cst_64 = arith.constant dense<0.000000e+00> : vector<32xf32>
    %130 = vector.multi_reduction <add>, %119, %cst_64 [1] : vector<32x128xf32> to vector<32xf32>
    %131 = vector.shape_cast %130 : vector<32xf32> to vector<32x1xf32>
    %cst_65 = arith.constant 1.562500e-02 : f32
    %132 = vector.broadcast %cst_65 : f32 to vector<32x1xf32>
    %133 = arith.mulf %131, %132 : vector<32x1xf32>
    %cst_66 = arith.constant 0.000000e+00 : f32
    %134 = vector.broadcast %cst_66 : f32 to vector<64x1xf32>
    %135 = tpu.concatenate %129, %133, %134 in 0 : vector<32x1xf32>, vector<32x1xf32>, vector<64x1xf32> -> vector<128x1xf32>
    %cst_67 = arith.constant dense<0.000000e+00> : vector<32x1xf32>
    %136 = tpu.matmul %120, %135, %cst_67 {dimension_numbers = #tpu.dot_dimension_numbers<[1], [0], [0], [1], [0, 0, 1, 1], [], []>} : vector<32x128xf32>, vector<128x1xf32>, vector<32x1xf32> -> vector<32x1xf32>
    %137 = arith.negf %136 : vector<32x1xf32>
    %138 = math.exp %137 : vector<32x1xf32>
    %cst_68 = arith.constant 1.000000e+00 : f32
    %139 = vector.broadcast %cst_68 : f32 to vector<32x1xf32>
    %140 = arith.addf %139, %138 : vector<32x1xf32>
    %141 = arith.divf %139, %140 : vector<32x1xf32>
    %142 = vector.broadcast %141 : vector<32x1xf32> to vector<32x128xf32>
    %143 = arith.mulf %119, %142 : vector<32x128xf32>
    %144 = vector.extract_strided_slice %143 {offsets = [0, 0], sizes = [8, 128], strides = [1, 1]} : vector<32x128xf32> to vector<8x128xf32>
    %145 = vector.extract_strided_slice %143 {offsets = [16, 0], sizes = [8, 128], strides = [1, 1]} : vector<32x128xf32> to vector<8x128xf32>
    %146 = tpu.concatenate %144, %145 in 0 : vector<8x128xf32>, vector<8x128xf32> -> vector<16x128xf32>
    %147 = vector.extract_strided_slice %143 {offsets = [8, 0], sizes = [8, 128], strides = [1, 1]} : vector<32x128xf32> to vector<8x128xf32>
    %148 = vector.extract_strided_slice %143 {offsets = [24, 0], sizes = [8, 128], strides = [1, 1]} : vector<32x128xf32> to vector<8x128xf32>
    %149 = tpu.concatenate %147, %148 in 0 : vector<8x128xf32>, vector<8x128xf32> -> vector<16x128xf32>
    %c1200 = arith.constant 1200 : index
    %c0_69 = arith.constant 0 : index
    %150 = vector.load %arg4[%c1200, %c0_69] : memref<2288x128xf32, #tpu.memory_space<vmem>>, vector<128x128xf32>
    %cst_70 = arith.constant dense<0.000000e+00> : vector<16x128xf32>
    %151 = tpu.matmul %146, %150, %cst_70 {dimension_numbers = #tpu.dot_dimension_numbers<[1], [0], [0], [1], [0, 0, 1, 1], [], []>} : vector<16x128xf32>, vector<128x128xf32>, vector<16x128xf32> -> vector<16x128xf32>
    %c1328 = arith.constant 1328 : index
    %c0_71 = arith.constant 0 : index
    %152 = vector.load %arg4[%c1328, %c0_71] : memref<2288x128xf32, #tpu.memory_space<vmem>>, vector<128x128xf32>
    %cst_72 = arith.constant dense<0.000000e+00> : vector<16x128xf32>
    %153 = tpu.matmul %149, %152, %cst_72 {dimension_numbers = #tpu.dot_dimension_numbers<[1], [0], [0], [1], [0, 0, 1, 1], [], []>} : vector<16x128xf32>, vector<128x128xf32>, vector<16x128xf32> -> vector<16x128xf32>
    %154 = arith.addf %151, %153 : vector<16x128xf32>
    %c1456 = arith.constant 1456 : index
    %c0_73 = arith.constant 0 : index
    %155 = vector.load %arg4[%c1456, %c0_73] : memref<2288x128xf32, #tpu.memory_space<vmem>>, vector<1x128xf32>
    %156 = vector.broadcast %155 : vector<1x128xf32> to vector<16x128xf32>
    %157 = arith.addf %154, %156 : vector<16x128xf32>
    %cst_74 = arith.constant 0.000000e+00 : f32
    %158 = vector.broadcast %cst_74 : f32 to vector<16x128xf32>
    %159 = arith.cmpf oge, %157, %158 : vector<16x128xf32>
    %cst_75 = arith.constant 0.00999999977 : f32
    %160 = vector.broadcast %cst_75 : f32 to vector<16x128xf32>
    %161 = arith.mulf %160, %157 : vector<16x128xf32>
    %162 = arith.select %159, %157, %161 : vector<16x128xi1>, vector<16x128xf32>
    %c1464 = arith.constant 1464 : index
    %c0_76 = arith.constant 0 : index
    %163 = vector.load %arg4[%c1464, %c0_76] : memref<2288x128xf32, #tpu.memory_space<vmem>>, vector<128x128xf32>
    %c1592 = arith.constant 1592 : index
    %c0_77 = arith.constant 0 : index
    %164 = vector.load %arg4[%c1592, %c0_77] : memref<2288x128xf32, #tpu.memory_space<vmem>>, vector<1x128xf32>
    %c1600 = arith.constant 1600 : index
    %c0_78 = arith.constant 0 : index
    %165 = vector.load %arg4[%c1600, %c0_78] : memref<2288x128xf32, #tpu.memory_space<vmem>>, vector<128x128xf32>
    %c1728 = arith.constant 1728 : index
    %c0_79 = arith.constant 0 : index
    %166 = vector.load %arg4[%c1728, %c0_79] : memref<2288x128xf32, #tpu.memory_space<vmem>>, vector<1x128xf32>
    %167 = vector.extract_strided_slice %162 {offsets = [0, 0], sizes = [8, 128], strides = [1, 1]} : vector<16x128xf32> to vector<8x128xf32>
    %168 = vector.extract_strided_slice %162 {offsets = [8, 0], sizes = [8, 128], strides = [1, 1]} : vector<16x128xf32> to vector<8x128xf32>
    %169 = arith.addf %167, %168 : vector<8x128xf32>
    %170 = arith.maximumf %167, %168 : vector<8x128xf32>
    %cst_80 = arith.constant 5.000000e-01 : f32
    %171 = vector.broadcast %cst_80 : f32 to vector<8x128xf32>
    %172 = arith.mulf %169, %171 : vector<8x128xf32>
    %173 = tpu.concatenate %172, %170 in 0 : vector<8x128xf32>, vector<8x128xf32> -> vector<16x128xf32>
    %cst_81 = arith.constant dense<0.000000e+00> : vector<16x128xf32>
    %174 = tpu.matmul %173, %163, %cst_81 {dimension_numbers = #tpu.dot_dimension_numbers<[1], [0], [0], [1], [0, 0, 1, 1], [], []>} : vector<16x128xf32>, vector<128x128xf32>, vector<16x128xf32> -> vector<16x128xf32>
    %175 = vector.broadcast %164 : vector<1x128xf32> to vector<16x128xf32>
    %176 = arith.addf %174, %175 : vector<16x128xf32>
    %cst_82 = arith.constant 0.000000e+00 : f32
    %177 = vector.broadcast %cst_82 : f32 to vector<16x128xf32>
    %178 = arith.maximumf %176, %177 : vector<16x128xf32>
    %cst_83 = arith.constant dense<0.000000e+00> : vector<16x128xf32>
    %179 = tpu.matmul %178, %165, %cst_83 {dimension_numbers = #tpu.dot_dimension_numbers<[1], [0], [0], [1], [0, 0, 1, 1], [], []>} : vector<16x128xf32>, vector<128x128xf32>, vector<16x128xf32> -> vector<16x128xf32>
    %180 = vector.broadcast %166 : vector<1x128xf32> to vector<16x128xf32>
    %181 = arith.addf %179, %180 : vector<16x128xf32>
    %182 = vector.extract_strided_slice %181 {offsets = [0, 0], sizes = [8, 128], strides = [1, 1]} : vector<16x128xf32> to vector<8x128xf32>
    %183 = vector.extract_strided_slice %181 {offsets = [8, 0], sizes = [8, 128], strides = [1, 1]} : vector<16x128xf32> to vector<8x128xf32>
    %184 = arith.addf %182, %183 : vector<8x128xf32>
    %185 = arith.negf %184 : vector<8x128xf32>
    %186 = math.exp %185 : vector<8x128xf32>
    %cst_84 = arith.constant 1.000000e+00 : f32
    %187 = vector.broadcast %cst_84 : f32 to vector<8x128xf32>
    %188 = arith.addf %187, %186 : vector<8x128xf32>
    %189 = arith.divf %187, %188 : vector<8x128xf32>
    %190 = tpu.concatenate %189, %189 in 0 : vector<8x128xf32>, vector<8x128xf32> -> vector<16x128xf32>
    %191 = arith.mulf %162, %190 : vector<16x128xf32>
    %c1736 = arith.constant 1736 : index
    %c0_85 = arith.constant 0 : index
    %192 = vector.load %arg4[%c1736, %c0_85] : memref<2288x128xf32, #tpu.memory_space<vmem>>, vector<16x128xf32>
    %cst_86 = arith.constant dense<0xFF800000> : vector<16xf32>
    %193 = vector.multi_reduction <maximumf>, %191, %cst_86 [1] : vector<16x128xf32> to vector<16xf32>
    %194 = vector.shape_cast %193 : vector<16xf32> to vector<16x1xf32>
    %cst_87 = arith.constant dense<0.000000e+00> : vector<16xf32>
    %195 = vector.multi_reduction <add>, %191, %cst_87 [1] : vector<16x128xf32> to vector<16xf32>
    %196 = vector.shape_cast %195 : vector<16xf32> to vector<16x1xf32>
    %cst_88 = arith.constant 7.812500e-03 : f32
    %197 = vector.broadcast %cst_88 : f32 to vector<16x1xf32>
    %198 = arith.mulf %196, %197 : vector<16x1xf32>
    %cst_89 = arith.constant 0.000000e+00 : f32
    %199 = vector.broadcast %cst_89 : f32 to vector<96x1xf32>
    %200 = tpu.concatenate %194, %198, %199 in 0 : vector<16x1xf32>, vector<16x1xf32>, vector<96x1xf32> -> vector<128x1xf32>
    %cst_90 = arith.constant dense<0.000000e+00> : vector<16x1xf32>
    %201 = tpu.matmul %192, %200, %cst_90 {dimension_numbers = #tpu.dot_dimension_numbers<[1], [0], [0], [1], [0, 0, 1, 1], [], []>} : vector<16x128xf32>, vector<128x1xf32>, vector<16x1xf32> -> vector<16x1xf32>
    %202 = arith.negf %201 : vector<16x1xf32>
    %203 = math.exp %202 : vector<16x1xf32>
    %cst_91 = arith.constant 1.000000e+00 : f32
    %204 = vector.broadcast %cst_91 : f32 to vector<16x1xf32>
    %205 = arith.addf %204, %203 : vector<16x1xf32>
    %206 = arith.divf %204, %205 : vector<16x1xf32>
    %207 = vector.broadcast %206 : vector<16x1xf32> to vector<16x128xf32>
    %208 = arith.mulf %191, %207 : vector<16x128xf32>
    %209 = vector.extract_strided_slice %208 {offsets = [0, 0], sizes = [8, 128], strides = [1, 1]} : vector<16x128xf32> to vector<8x128xf32>
    %210 = vector.extract_strided_slice %208 {offsets = [8, 0], sizes = [8, 128], strides = [1, 1]} : vector<16x128xf32> to vector<8x128xf32>
    %c0_92 = arith.constant 0 : index
    %c0_93 = arith.constant 0 : index
    %211 = vector.load %arg5[%c0_92, %c0_93] : memref<400x256xf32, #tpu.memory_space<vmem>>, vector<128x256xf32>
    %cst_94 = arith.constant dense<0.000000e+00> : vector<8x256xf32>
    %212 = tpu.matmul %209, %211, %cst_94 {dimension_numbers = #tpu.dot_dimension_numbers<[1], [0], [0], [1], [0, 0, 1, 1], [], []>} : vector<8x128xf32>, vector<128x256xf32>, vector<8x256xf32> -> vector<8x256xf32>
    %c128 = arith.constant 128 : index
    %c0_95 = arith.constant 0 : index
    %213 = vector.load %arg5[%c128, %c0_95] : memref<400x256xf32, #tpu.memory_space<vmem>>, vector<128x256xf32>
    %cst_96 = arith.constant dense<0.000000e+00> : vector<8x256xf32>
    %214 = tpu.matmul %210, %213, %cst_96 {dimension_numbers = #tpu.dot_dimension_numbers<[1], [0], [0], [1], [0, 0, 1, 1], [], []>} : vector<8x128xf32>, vector<128x256xf32>, vector<8x256xf32> -> vector<8x256xf32>
    %215 = arith.addf %212, %214 : vector<8x256xf32>
    %c256 = arith.constant 256 : index
    %c0_97 = arith.constant 0 : index
    %216 = vector.load %arg5[%c256, %c0_97] : memref<400x256xf32, #tpu.memory_space<vmem>>, vector<1x256xf32>
    %217 = vector.broadcast %216 : vector<1x256xf32> to vector<8x256xf32>
    %218 = arith.addf %215, %217 : vector<8x256xf32>
    %cst_98 = arith.constant 0.000000e+00 : f32
    %219 = vector.broadcast %cst_98 : f32 to vector<8x256xf32>
    %220 = arith.cmpf oge, %218, %219 : vector<8x256xf32>
    %cst_99 = arith.constant 0.00999999977 : f32
    %221 = vector.broadcast %cst_99 : f32 to vector<8x256xf32>
    %222 = arith.mulf %221, %218 : vector<8x256xf32>
    %223 = arith.select %220, %218, %222 : vector<8x256xi1>, vector<8x256xf32>
    %c1752 = arith.constant 1752 : index
    %c0_100 = arith.constant 0 : index
    %224 = vector.load %arg4[%c1752, %c0_100] : memref<2288x128xf32, #tpu.memory_space<vmem>>, vector<256x128xf32>
    %c2008 = arith.constant 2008 : index
    %c0_101 = arith.constant 0 : index
    %225 = vector.load %arg4[%c2008, %c0_101] : memref<2288x128xf32, #tpu.memory_space<vmem>>, vector<1x128xf32>
    %c264 = arith.constant 264 : index
    %c0_102 = arith.constant 0 : index
    %226 = vector.load %arg5[%c264, %c0_102] : memref<400x256xf32, #tpu.memory_space<vmem>>, vector<128x256xf32>
    %c392 = arith.constant 392 : index
    %c0_103 = arith.constant 0 : index
    %227 = vector.load %arg5[%c392, %c0_103] : memref<400x256xf32, #tpu.memory_space<vmem>>, vector<1x256xf32>
    %cst_104 = arith.constant 1.000000e+00 : f32
    %228 = vector.broadcast %cst_104 : f32 to vector<8x256xf32>
    %229 = arith.mulf %223, %228 : vector<8x256xf32>
    %230 = tpu.concatenate %229, %223 in 0 : vector<8x256xf32>, vector<8x256xf32> -> vector<16x256xf32>
    %cst_105 = arith.constant dense<0.000000e+00> : vector<16x128xf32>
    %231 = tpu.matmul %230, %224, %cst_105 {dimension_numbers = #tpu.dot_dimension_numbers<[1], [0], [0], [1], [0, 0, 1, 1], [], []>} : vector<16x256xf32>, vector<256x128xf32>, vector<16x128xf32> -> vector<16x128xf32>
    %232 = vector.broadcast %225 : vector<1x128xf32> to vector<16x128xf32>
    %233 = arith.addf %231, %232 : vector<16x128xf32>
    %cst_106 = arith.constant 0.000000e+00 : f32
    %234 = vector.broadcast %cst_106 : f32 to vector<16x128xf32>
    %235 = arith.maximumf %233, %234 : vector<16x128xf32>
    %cst_107 = arith.constant dense<0.000000e+00> : vector<16x256xf32>
    %236 = tpu.matmul %235, %226, %cst_107 {dimension_numbers = #tpu.dot_dimension_numbers<[1], [0], [0], [1], [0, 0, 1, 1], [], []>} : vector<16x128xf32>, vector<128x256xf32>, vector<16x256xf32> -> vector<16x256xf32>
    %237 = vector.broadcast %227 : vector<1x256xf32> to vector<16x256xf32>
    %238 = arith.addf %236, %237 : vector<16x256xf32>
    %239 = vector.extract_strided_slice %238 {offsets = [0, 0], sizes = [8, 256], strides = [1, 1]} : vector<16x256xf32> to vector<8x256xf32>
    %240 = vector.extract_strided_slice %238 {offsets = [8, 0], sizes = [8, 256], strides = [1, 1]} : vector<16x256xf32> to vector<8x256xf32>
    %241 = arith.addf %239, %240 : vector<8x256xf32>
    %242 = arith.negf %241 : vector<8x256xf32>
    %243 = math.exp %242 : vector<8x256xf32>
    %cst_108 = arith.constant 1.000000e+00 : f32
    %244 = vector.broadcast %cst_108 : f32 to vector<8x256xf32>
    %245 = arith.addf %244, %243 : vector<8x256xf32>
    %246 = arith.divf %244, %245 : vector<8x256xf32>
    %247 = arith.mulf %223, %246 : vector<8x256xf32>
    %c2016 = arith.constant 2016 : index
    %c0_109 = arith.constant 0 : index
    %248 = vector.load %arg4[%c2016, %c0_109] : memref<2288x128xf32, #tpu.memory_space<vmem>>, vector<8x128xf32>
    %cst_110 = arith.constant dense<0xFF800000> : vector<8xf32>
    %249 = vector.multi_reduction <maximumf>, %247, %cst_110 [1] : vector<8x256xf32> to vector<8xf32>
    %250 = vector.shape_cast %249 : vector<8xf32> to vector<8x1xf32>
    %cst_111 = arith.constant dense<0.000000e+00> : vector<8xf32>
    %251 = vector.multi_reduction <add>, %247, %cst_111 [1] : vector<8x256xf32> to vector<8xf32>
    %252 = vector.shape_cast %251 : vector<8xf32> to vector<8x1xf32>
    %cst_112 = arith.constant 3.906250e-03 : f32
    %253 = vector.broadcast %cst_112 : f32 to vector<8x1xf32>
    %254 = arith.mulf %252, %253 : vector<8x1xf32>
    %cst_113 = arith.constant 0.000000e+00 : f32
    %255 = vector.broadcast %cst_113 : f32 to vector<112x1xf32>
    %256 = tpu.concatenate %250, %254, %255 in 0 : vector<8x1xf32>, vector<8x1xf32>, vector<112x1xf32> -> vector<128x1xf32>
    %cst_114 = arith.constant dense<0.000000e+00> : vector<8x1xf32>
    %257 = tpu.matmul %248, %256, %cst_114 {dimension_numbers = #tpu.dot_dimension_numbers<[1], [0], [0], [1], [0, 0, 1, 1], [], []>} : vector<8x128xf32>, vector<128x1xf32>, vector<8x1xf32> -> vector<8x1xf32>
    %258 = arith.negf %257 : vector<8x1xf32>
    %259 = math.exp %258 : vector<8x1xf32>
    %cst_115 = arith.constant 1.000000e+00 : f32
    %260 = vector.broadcast %cst_115 : f32 to vector<8x1xf32>
    %261 = arith.addf %260, %259 : vector<8x1xf32>
    %262 = arith.divf %260, %261 : vector<8x1xf32>
    %263 = vector.broadcast %262 : vector<8x1xf32> to vector<8x256xf32>
    %264 = arith.mulf %247, %263 : vector<8x256xf32>
    %c2024 = arith.constant 2024 : index
    %c0_116 = arith.constant 0 : index
    %265 = vector.load %arg4[%c2024, %c0_116] : memref<2288x128xf32, #tpu.memory_space<vmem>>, vector<256x128xf32>
    %cst_117 = arith.constant dense<0.000000e+00> : vector<8x128xf32>
    %266 = tpu.matmul %264, %265, %cst_117 {dimension_numbers = #tpu.dot_dimension_numbers<[1], [0], [0], [1], [0, 0, 1, 1], [], []>} : vector<8x256xf32>, vector<256x128xf32>, vector<8x128xf32> -> vector<8x128xf32>
    %c2280 = arith.constant 2280 : index
    %c0_118 = arith.constant 0 : index
    %267 = vector.load %arg4[%c2280, %c0_118] : memref<2288x128xf32, #tpu.memory_space<vmem>>, vector<1x128xf32>
    %268 = vector.broadcast %267 : vector<1x128xf32> to vector<8x128xf32>
    %269 = arith.addf %266, %268 : vector<8x128xf32>
    %cst_119 = arith.constant 0.000000e+00 : f32
    %270 = vector.broadcast %cst_119 : f32 to vector<8x128xf32>
    %271 = arith.cmpf oge, %269, %270 : vector<8x128xf32>
    %cst_120 = arith.constant 0.00999999977 : f32
    %272 = vector.broadcast %cst_120 : f32 to vector<8x128xf32>
    %273 = arith.mulf %272, %269 : vector<8x128xf32>
    %274 = arith.select %271, %269, %273 : vector<8x128xi1>, vector<8x128xf32>
    %c0_121 = arith.constant 0 : index
    %c0_122 = arith.constant 0 : index
    %275 = vector.load %arg7[%c0_121, %c0_122] : memref<8x128xf32, #tpu.memory_space<vmem>>, vector<8x128xf32>
    tpu.vector_store %arg7[%c0_121, %c0_122], %274 {strides = array<i32>} : memref<8x128xf32, #tpu.memory_space<vmem>>, vector<8x128xf32>,
    return
  }
}

</mosaic_0001>

<bundles_post_ra>
// kernel: net_gin_conv_forward.1
= control target key start
LH: loop header
LB: loop body
LE: loop exit
PB: predicated region body
PF: predicated region fallthrough
CT: control target
= control target key end

     0   :  { %13 = vsyncpa [#allocation4], 0  ;;  %s4614_s0 = inlined_call_operand.vmem [shape: f32[8,16], index: 0, kind: input, shape index: {}]   ;;  %s4615_s1 = inlined_call_operand.hbm [shape: f32[8,32], index: 1, kind: input, shape index: {}]   ;;  %s4616_s2 = inlined_call_operand.vmem [shape: s32[16,1], index: 2, kind: input, shape index: {}]   ;;  %s4617_s3 = inlined_call_operand.vmem [shape: s32[1,16], index: 3, kind: input, shape index: {}]   ;;  %s4618_s4 = inlined_call_operand.hbm [shape: f32[2288,128], index: 4, kind: input, shape index: {}]   ;;  %s4619_s5 = inlined_call_operand.hbm [shape: f32[400,256], index: 5, kind: input, shape index: {}]   ;;  %s4620_s6 = inlined_call_operand.<no memory space> [shape: f32[1,1], index: 6, kind: input, shape index: {}]   ;;  %s4621_s7 = inlined_call_operand.vmem [shape: f32[8,128], index: 7, kind: output, shape index: {}]  }
   0x1   :  { %14 = vsyncpa [#allocation6], 0  ;;  %s4307_s24 = smov [#allocation5]   ;;  %s4237_s28 = scalar_lea.hbm %s4618_s4, 36608 }
   0x2   :  { %s36_s25 = sshll.u32 %s4307_s24, 4  ;;  %p4238_p0 = scmp.ne.s32.totalorder %s4618_s4, %s4237_s28  ;;  %s37_s25 = int_to_ptr.vmem [resolvable:$true] %s36_s25 }
   0x3   :  { %p4241_p1 = scmp.lt.u32.totalorder %s4237_s28, %s4618_s4 }
   0x5   :  { %p4243_p2 = pnand %p4241_p1, %p4238_p0 }
   0x7   :  { %4246 = shalt.err (!%p4243_p2)
}
   0x8   :  { %s4247_s10 = scalar_lea.vmem %s37_s25, 36608  ;;  %p4252_p4 = scmp.lt.s32.totalorder %s37_s25, %s37_s25 }
   0x9   :  { %p4248_p3 = scmp.ne.s32.totalorder %s37_s25, %s4247_s10  ;;  %p4253_p5 = scmp.lt.s32.totalorder %s4247_s10, %s4247_s10 }
   0xb   :  { %p4254_p6 = por %p4253_p5, %p4252_p4 }
   0xd   :  { %p4255_p7 = pnand %p4254_p6, %p4248_p3 }
   0xf   :  { %4258 = shalt.err (!%p4255_p7)
}
  0x10   :  { %s4308_s11 = smov 128   ;;  %s4309_s12 = smov 8  }
  0x11   :  { %42 = dma.hbm_to_vmem [thread:$0]  %s4618_s4, 36608, %s37_s25, [#allocation6], %s4308_s11, %s4308_s11, %s4309_s12  }
  0x12   :  { %s4310_s15 = smov [#allocation3]   ;;  %s4311_s17 = smov [#allocation7]  }
  0x13   :  { %s23_s16 = sshll.u32 %s4310_s15, 4  ;;  %s48_s18 = sshll.u32 %s4311_s17, 4  ;;  %s24_s16 = int_to_ptr.vmem [resolvable:$true] %s23_s16  ;;  %s49_s18 = int_to_ptr.vmem [resolvable:$true] %s48_s18 }
  0x14   :  { %s4259_s21 = scalar_lea.hbm %s4615_s1, 128 }
  0x15   :  { %p4260_p8 = scmp.ne.s32.totalorder %s4615_s1, %s4259_s21  ;;  %p4263_p9 = scmp.lt.u32.totalorder %s4259_s21, %s4615_s1 }
  0x17   :  { %p4265_p10 = pnand %p4263_p9, %p4260_p8 }
  0x19   :  { %4268 = shalt.err (!%p4265_p10)
}
  0x1a   :  { %s4269_s4 = scalar_lea.vmem %s24_s16, 128  ;;  %p4274_p12 = scmp.lt.s32.totalorder %s24_s16, %s24_s16 }
  0x1b   :  { %p4270_p11 = scmp.ne.s32.totalorder %s24_s16, %s4269_s4  ;;  %p4275_p13 = scmp.lt.s32.totalorder %s4269_s4, %s4269_s4 }
  0x1d   :  { %p4276_p0 = por %p4275_p13, %p4274_p12 }
  0x1f   :  { %p4277_p1 = pnand %p4276_p0, %p4270_p11 }
  0x21   :  { %4280 = shalt.err (!%p4277_p1)
}
  0x22   :  { %26 = dma.hbm_to_vmem [thread:$0]  %s4615_s1, 128, %s24_s16, [#allocation4]  }
  0x23   :  { %s4281_s30 = scalar_lea.hbm %s4619_s5, 12800 }
  0x24   :  { %p4282_p2 = scmp.ne.s32.totalorder %s4619_s5, %s4281_s30  ;;  %p4285_p3 = scmp.lt.u32.totalorder %s4281_s30, %s4619_s5 }
  0x26   :  { %p4287_p4 = pnand %p4285_p3, %p4282_p2 }
  0x28   :  { %4290 = shalt.err (!%p4287_p4)
}
  0x29   :  { %s4291_s12 = scalar_lea.vmem %s49_s18, 12800  ;;  %p4296_p6 = scmp.lt.s32.totalorder %s49_s18, %s49_s18 }
  0x2a   :  { %p4292_p5 = scmp.ne.s32.totalorder %s49_s18, %s4291_s12  ;;  %p4297_p7 = scmp.lt.s32.totalorder %s4291_s12, %s4291_s12 }
  0x2c   :  { %p4298_p8 = por %p4297_p7, %p4296_p6 }
  0x2e   :  { %p4299_p9 = pnand %p4298_p8, %p4292_p5 }
  0x30   :  { %4302 = shalt.err (!%p4299_p9)
}
  0x31   :  { %s4312_s1 = smov 256   ;;  %s4313_s13 = smov 16  }
  0x32   :  { %54 = dma.hbm_to_vmem [thread:$0]  %s4619_s5, 12800, %s49_s18, [#allocation6], %s4312_s1, %s4312_s1, %s4313_s13  }
  0x33   :  { %4303 = dma.done.wait [#allocation4], 128  }
  0x34   :  { %4304 = vsyncadd [#allocation4], 4294967168 }
  0x35   :  { %4305 = dma.done.wait [#allocation6], 49408  }
  0x36   :  { %4306 = vsyncadd [#allocation6], 4294917888  ;;  %v4314_v0 = vmov 0   ;;  %v4315_v1 = vmov 0.0|0.0   ;;  %vm4316_vm0 = vmmov 0   ;;  %v4317_v2 = vmov 0.0  }
  0x37   :  { %4191 = vset.pattern.permute.xlu0 %v4314_v0  ;;  %3625 = vmatprep.subr.bf16.mxu0 %v4315_v1  ;;  %v359_v3 = vld [vmem:[%s4616_s2] sm:$0xff]  ;;  %v68_v5 = vld [vmem:[#allocation5 + $0x140] sm:$0xff]  ;;  %v143_v6 = vld [vmem:[#allocation5 + $0x148] sm:$0xff]  ;;  %vm69_vm1 = vcmask 130048   ;;  %v361_v15 = vlaneseq  ;;  %v4318_v23 = vmov 1.0|1.0  }
  0x38   :  { %3118 = vmatprep.mubr.msk.f32.mxu0 %vm4316_vm0, %v4317_v2  ;;  %3634 = vmatprep.subr.bf16.mxu1 %v4315_v1  ;;  %v67_v4 = vld [vmem:[#allocation5 + $0x138] sm:$0xff]  ;;  %v360_v7 = vld [vmem:[%s4616_s2 + $0x8] sm:$0xff]  ;;  %v144_v9 = vld [vmem:[#allocation5 + $0x150] sm:$0xff]  ;;  %vm465_vm6 = vcmask 261120   ;;  %vm546_vm8 = vcmask 64512   ;;  %s543_s22 = sadd.f32 1.0, %s4620_s6 }
  0x39   :  { %3139 = vmatprep.mubr.msk.f32.mxu1 %vm4316_vm0, %v4317_v2  ;;  %4192 = vset.pattern.permute.xlu1 %v4314_v0  ;;  %v3626_v8 = vpack.c.bf16 %v68_v5, %v67_v4  ;;  %v4410_v10 = vld [vmem:[%s4614_s0] sm:$0xff]  ;;  %v3629_v11 = vpack.c.bf16 %v144_v9, %v143_v6  ;;  %v216_v13 = vld [vmem:[#allocation5 + $0x160] sm:$0xff]  ;;  %v4427_v16 = vshrl.u32 %v361_v15, 7  ;;  %v4429_v18 = vand.u32 127, %v361_v15  ;;  %v457_v22 = vld [vmem:[#allocation5 + $0x8] sm:$0xff] }
  0x3a   :  { %364 = vperm.xlu0 %4191, %v359_v3   ;;  %v215_v12 = vld [vmem:[#allocation5 + $0x158] sm:$0xff]  ;;  %v456_v21 = vld [vmem:[#allocation5] sm:$0xff]  ;;  %v458_v26 = vld [vmem:[#allocation5 + $0x10] sm:$0xff] }
  0x3b   :  { %3627 = vmatpush3.bf16.msra.mxu0 %v3626_v8  ;;  %v3632_v14 = vpack.c.bf16 %v216_v13, %v215_v12  ;;  %v2760_v19 = vld [vmem:[%s4617_s3] ss:$0 sm:$0xff]  ;;  %v3641_v25 = vpack.c.bf16 %v457_v22, %v456_v21  ;;  %v2764_v38 = vld [vmem:[#allocation5 + $0x20] ss:$0 sm:$0xff]  ;;  %v621_v42 = vld [vmem:[#allocation5 + $0x28] sm:$0xff] }
  0x3c   :  { %3628 = vmatprep.subr.bf16.mxu0 %v4315_v1  ;;  %vm380_vm2 = vcmp.eq.s32.totalorder %v2760_v19, %v4427_v16  ;;  %v459_v27 = vld [vmem:[#allocation5 + $0x18] sm:$0xff]  ;;  %v622_v43 = vld [vmem:[#allocation5 + $0x30] sm:$0xff]  ;;  %v624_v48 = vld [vmem:[#allocation5 + $0x40] sm:$0xff] }
  0x3d   :  { %v381_v24 = vsel %vm380_vm2, 1.0, %v4317_v2  ;;  %v3644_v28 = vpack.c.bf16 %v459_v27, %v458_v26  ;;  %v455_v29 = vld [vmem:[#allocation3] sm:$0xff]  ;;  %v3647_v45 = vpack.c.bf16 %v622_v43, %v621_v42  ;;  %v625_v50 = vld [vmem:[#allocation5 + $0x48] sm:$0xff]  ;;  %v626_v51 = vld [vmem:[#allocation5 + $0x50] sm:$0xff] }
  0x3e   :  { %367 = vperm.xlu0 %4191, %v360_v7   ;;  %3119 = vmatmul.mubr.msk.f32.vlgmr.msra.gmra.mrb[0].mxu0 %vm69_vm1, %v4410_v10  ;;  %v623_v47 = vld [vmem:[#allocation5 + $0x38] sm:$0xff]  ;;  %v3653_v52 = vpack.c.bf16 %v626_v51, %v625_v50  ;;  %v628_v54 = vld [vmem:[#allocation5 + $0x60] sm:$0xff]  ;;  %v629_v56 = vld [vmem:[#allocation5 + $0x68] sm:$0xff] }
  0x3f   :  { %3630 = vmatpush3.bf16.msra.mxu0 %v3629_v11  ;;  %3125 = vmatprep.mubr.msk.f32.mxu0 %vm4316_vm0, %v4317_v2  ;;  %v3650_v49 = vpack.c.bf16 %v624_v48, %v623_v47  ;;  %v627_v53 = vld [vmem:[#allocation5 + $0x58] sm:$0xff]  ;;  %v630_v57 = vld [vmem:[#allocation5 + $0x70] sm:$0xff]  ;;  %v632_v60 = vld [vmem:[#allocation5 + $0x80] sm:$0xff] }
  0x40   :  { %3631 = vmatprep.subr.bf16.mxu0 %v4315_v1  ;;  %v3656_v55 = vpack.c.bf16 %v628_v54, %v627_v53  ;;  %v3659_v58 = vpack.c.bf16 %v630_v57, %v629_v56  ;;  %v631_v59 = vld [vmem:[#allocation5 + $0x78] sm:$0xff]  ;;  %v633_v62 = vld [vmem:[#allocation5 + $0x88] sm:$0xff]  ;;  %v634_v63 = vld [vmem:[#allocation5 + $0x90] sm:$0xff] }
  0x41   :  { %v3662_v61 = vpack.c.bf16 %v632_v60, %v631_v59  ;;  %v3665_v0 = vpack.c.bf16 %v634_v63, %v633_v62  ;;  %v635_v3 = vld [vmem:[#allocation5 + $0x98] sm:$0xff]  ;;  %v636_v4 = vld [vmem:[#allocation5 + $0xa0] sm:$0xff]  ;;  %v287_v6 = vld [vmem:[#allocation5 + $0x168] sm:$0xff] }
  0x42   :  { %3126 = vmatmul.mubr.msk.f32.vlgmr.msra.gmra.mrb[2].mxu0 %vm69_vm1, %v4410_v10  ;;  %v3668_v5 = vpack.c.bf16 %v636_v4, %v635_v3  ;;  %v288_v7 = vld [vmem:[#allocation5 + $0x170] sm:$0xff]  ;;  %v716_v11 = vld [vmem:[#allocation5 + $0xb8] sm:$0xff]  ;;  %v717_v13 = vld [vmem:[#allocation5 + $0xc0] sm:$0xff] }
  0x43   :  { %3633 = vmatpush3.bf16.msra.mxu0 %v3632_v14  ;;  %3132 = vmatprep.mubr.msk.f32.mxu0 %vm4316_vm0, %v4317_v2  ;;  %v715_v8 = vld [vmem:[#allocation5 + $0xb0] sm:$0xff]  ;;  %v3635_v9 = vpack.c.bf16 %v288_v7, %v287_v6  ;;  %v718_v14 = vld [vmem:[#allocation5 + $0xc8] sm:$0xff]  ;;  %v720_v19 = vld [vmem:[#allocation5 + $0xd8] sm:$0xff] }
  0x44   :  { %3637 = vmatprep.subr.bf16.mxu0 %v4315_v1  ;;  %v3671_v12 = vpack.c.bf16 %v716_v11, %v715_v8  ;;  %v3674_v15 = vpack.c.bf16 %v718_v14, %v717_v13  ;;  %v721_v21 = vld [vmem:[#allocation5 + $0xe0] sm:$0xff]  ;;  %v722_v22 = vld [vmem:[#allocation5 + $0xe8] sm:$0xff]  ;;  %v816_v51 = vld [vmem:[#allocation5 + $0x198] sm:$0xff] }
  0x45   :  { %3636 = vmatpush3.bf16.msra.mxu1 %v3635_v9  ;;  %v725_v26 = vld [vmem:[#allocation5 + $0x100] sm:$0xff]  ;;  %v726_v27 = vld [vmem:[#allocation5 + $0x108] sm:$0xff]  ;;  %v820_v57 = vld [vmem:[#allocation5 + $0x1b8] sm:$0xff] }
  0x46   :  { %3133 = vmatmul.mubr.msk.f32.vlgmr.msra.gmra.mrb[4].mxu0 %vm69_vm1, %v4410_v10  ;;  %3670 = vmatprep.subr.bf16.mxu1 %v4315_v1  ;;  %v818_v54 = vld [vmem:[#allocation5 + $0x1a8] sm:$0xff]  ;;  %v898_v3 = vld [vmem:[#allocation5 + $0x1f8] sm:$0xff]  ;;  %v899_v4 = vld [vmem:[#allocation5 + $0x200] sm:$0xff] }
  0x47   :  { %3146 = vmatprep.mubr.msk.f32.mxu0 %vm4316_vm0, %v4317_v2  ;;  %v822_v60 = vld [vmem:[#allocation5 + $0x1c8] sm:$0xff]  ;;  %v3719_v8 = vpack.c.bf16 %v899_v4, %v898_v3  ;;  %v901_v11 = vld [vmem:[#allocation5 + $0x210] sm:$0xff]  ;;  %v902_v14 = vld [vmem:[#allocation5 + $0x218] sm:$0xff] }
  0x48   :  { %3140 = vmatmul.mubr.msk.f32.vlgmr.msra.gmra.mrb[0].mxu1 %vm69_vm1, %v4410_v10  ;;  %v723_v10 = vld [vmem:[#allocation5 + $0xf0] sm:$0xff]  ;;  %v2767_v63 = vld [vmem:[#allocation5 + $0xa8] ss:$0 sm:$0xff]  ;;  %v1074_v3 = vld [vmem:[#allocation5 + $0x318] sm:$0xff] }
  0x49   :  { %3672 = vmatpush3.bf16.msra.mxu1 %v3671_v12  ;;  %3232 = vmatprep.mubr.msk.f32.mxu1 %vm4316_vm0, %v4317_v2  ;;  %v900_v9 = vld [vmem:[#allocation5 + $0x208] sm:$0xff]  ;;  %v1075_v4 = vld [vmem:[#allocation5 + $0x320] sm:$0xff] }
  0x4a   :  { %3673 = vmatprep.subr.bf16.mxu1 %v4315_v1  ;;  %v3722_v13 = vpack.c.bf16 %v901_v11, %v900_v9  ;;  %v1076_v9 = vld [vmem:[#allocation5 + $0x328] sm:$0xff]  ;;  %v1077_v11 = vld [vmem:[#allocation5 + $0x330] sm:$0xff] }
  0x4d   :  { %3675 = vmatpush3.bf16.msra.mxu1 %v3674_v15  ;;  %v903_v15 = vld [vmem:[#allocation5 + $0x220] sm:$0xff] }
  0x4e   :  { %3676 = vmatprep.subr.bf16.mxu1 %v4315_v1 }
  0xb9   :  { %v365_v17 = vpop.permute.xlu0 %364 }
  0xba   :  { %vm369_vm3 = vcmp.eq.s32.totalorder %v365_v17, %v4429_v18  ;;  %v719_v17 = vld [vmem:[#allocation5 + $0xd0] sm:$0xff] }
  0xbd   :  { %v368_v20 = vpop.permute.xlu0 %367 }
  0xbe   :  { %vm370_vm4 = vcmp.eq.s32.totalorder %v368_v20, %v4429_v18  ;;  %v3677_v20 = vpack.c.bf16 %v720_v19, %v719_v17  ;;  %v3725_v17 = vpack.c.bf16 %v903_v15, %v902_v14  ;;  %v904_v19 = vld [vmem:[#allocation5 + $0x228] sm:$0xff]  ;;  %v992_v14 = vld [vmem:[#allocation5 + $0x2b8] sm:$0xff]  ;;  %v993_v15 = vld [vmem:[#allocation5 + $0x2c0] sm:$0xff] }
  0xbf   :  { %vm3638_vm5 = vmpackc.low %vm370_vm4, %vm369_vm3 }
  0xc0   :  { %3639 = vmatpush3.bf16.msk.msra.mxu0 %vm3638_vm5, %v4318_v23  ;;  %3678 = vmatpush3.bf16.msra.mxu1 %v3677_v20  ;;  %v3680_v23 = vpack.c.bf16 %v722_v22, %v721_v21  ;;  %v905_v20 = vld [vmem:[#allocation5 + $0x230] sm:$0xff]  ;;  %v906_v22 = vld [vmem:[#allocation5 + $0x238] sm:$0xff] }
  0xc1   :  { %3640 = vmatprep.subr.bf16.mxu0 %v4315_v1  ;;  %3679 = vmatprep.subr.bf16.mxu1 %v4315_v1  ;;  %v3728_v21 = vpack.c.bf16 %v905_v20, %v904_v19  ;;  %v1079_v19 = vld [vmem:[#allocation5 + $0x340] sm:$0xff]  ;;  %v3755_v20 = vpack.c.bf16 %v993_v15, %v992_v14  ;;  %v1204_v15 = vld [vmem:[#allocation5 + $0x438] sm:$0xff] }
  0xc3   :  { %3147 = vmatmul.mubr.msk.f32.vlgmr.msra.gmra.mrb[6].mxu0 %vm69_vm1, %v381_v24  ;;  %v724_v24 = vld [vmem:[#allocation5 + $0xf8] sm:$0xff]  ;;  %vm1397_vm1 = vcmp.lt.s32.totalorder %v4429_v18, 64 }
  0xc4   :  { %3642 = vmatpush3.bf16.msra.mxu0 %v3641_v25  ;;  %3157 = vmatprep.mubr.msk.f32.mxu0 %vm4316_vm0, %v4317_v2  ;;  %v3683_v25 = vpack.c.bf16 %v724_v24, %v723_v10  ;;  %v908_v24 = vld [vmem:[#allocation5 + $0x248] sm:$0xff] }
  0xc5   :  { %3643 = vmatprep.subr.bf16.mxu0 %v4315_v1  ;;  %3681 = vmatpush3.bf16.msra.mxu1 %v3680_v23  ;;  %v907_v23 = vld [vmem:[#allocation5 + $0x240] sm:$0xff] }
  0xc6   :  { %3682 = vmatprep.subr.bf16.mxu1 %v4315_v1  ;;  %v3731_v10 = vpack.c.bf16 %v907_v23, %v906_v22  ;;  %v994_v22 = vld [vmem:[#allocation5 + $0x2c8] sm:$0xff]  ;;  %v995_v23 = vld [vmem:[#allocation5 + $0x2d0] sm:$0xff] }
  0xc8   :  { %3645 = vmatpush3.bf16.msra.mxu0 %v3644_v28  ;;  %v3686_v28 = vpack.c.bf16 %v726_v27, %v725_v26  ;;  %v824_v27 = vld [vmem:[#allocation5 + $0x1d8] sm:$0xff] }
  0xc9   :  { %3160 = vmatprep.subr.mxu0 %v4317_v2  ;;  %3684 = vmatpush3.bf16.msra.mxu1 %v3683_v25  ;;  %v909_v25 = vld [vmem:[#allocation5 + $0x250] sm:$0xff] }
  0xca   :  { %3685 = vmatprep.subr.bf16.mxu1 %v4315_v1  ;;  %v3734_v26 = vpack.c.bf16 %v909_v25, %v908_v24  ;;  %v1081_v24 = vld [vmem:[#allocation5 + $0x350] sm:$0xff]  ;;  %v3758_v25 = vpack.c.bf16 %v995_v23, %v994_v22  ;;  %v1208_v23 = vld [vmem:[#allocation5 + $0x458] sm:$0xff] }
  0xcb   :  { %3158 = vmatmul.mubr.msk.f32.vlgmr.msra.gmra.mrb[8].mxu0 %vm465_vm6, %v455_v29  ;;  %v727_v29 = vld [vmem:[#allocation5 + $0x110] sm:$0xff] }
  0xcc   :  { %3162 = vmatprep.mubr.msk.f32.mxu0 %vm4316_vm0, %v4317_v2 }
  0xcd   :  { %3687 = vmatpush3.bf16.msra.mxu1 %v3686_v28  ;;  %v825_v28 = vld [vmem:[#allocation5 + $0x1e0] sm:$0xff] }
  0xce   :  { %3688 = vmatprep.subr.bf16.mxu1 %v4315_v1 }
 0x111   :  { %v4446_v30 = vpop.f32.mrb[0].mxu0 }
 0x112   :  { %v3120_v31 = vpop.f32.mrb[1].mxu0 }
 0x113   :  { %v728_v31 = vld [vmem:[#allocation5 + $0x118] sm:$0xff] }
 0x115   :  { %v4448_v32 = vpop.f32.mrb[2].mxu0 }
 0x116   :  { %v3127_v33 = vpop.f32.mrb[3].mxu0 }
 0x117   :  { %v3689_v33 = vpack.c.bf16 %v728_v31, %v727_v29  ;;  %v910_v29 = vld [vmem:[#allocation5 + $0x258] sm:$0xff]  ;;  %v3713_v31 = vpack.c.bf16 %v825_v28, %v824_v27  ;;  %v997_v28 = vld [vmem:[#allocation5 + $0x2e0] sm:$0xff] }
 0x118   :  { %v996_v27 = vld [vmem:[#allocation5 + $0x2d8] sm:$0xff] }
 0x119   :  { %v4450_v34 = vpop.f32.mrb[4].mxu0  ;;  %3690 = vmatpush3.bf16.msra.mxu1 %v3689_v33  ;;  %v911_v33 = vld [vmem:[#allocation5 + $0x260] sm:$0xff] }
 0x11a   :  { %v3134_v35 = vpop.f32.mrb[5].mxu0  ;;  %3691 = vmatprep.subr.bf16.mxu1 %v4315_v1 }
 0x11b   :  { %v544_v35 = vstv %s543_s22  ;;  %v4485_v43 = vpop.f32.mrb[0].mxu1 }
 0x11c   :  { %v3141_v47 = vpop.f32.mrb[1].mxu1 }
 0x196   :  { %v451_v36 = vpop.f32.mrb[6].mxu0 }
 0x197   :  { %v3148_v37 = vpop.f32.mrb[7].mxu0 }
 0x19e   :  { %v535_v39 = vpop.f32.mrb[8].mxu0 }
 0x19f   :  { %v536_v40 = vadd.f32 %v2764_v38, %v535_v39  ;;  %v3159_v41 = vpop.f32.mrb[9].mxu0 }
 0x1a0   :  { %v730_v41 = vld [vmem:[#allocation5 + $0x128] sm:$0xff] }
 0x1a1   :  { %vm539_vm7 = vcmp.ge.f32.partialorder %v536_v40, 0.0  ;;  %v540_v44 = vmul.f32 0.01, %v536_v40 }
 0x1a3   :  { %v4452_v46 = vsel %vm539_vm7, %v536_v40, %v540_v44  ;;  %v729_v40 = vld [vmem:[#allocation5 + $0x120] sm:$0xff]  ;;  %v812_v44 = vld [vmem:[#allocation5 + $0x178] sm:$0xff] }
 0x1a4   :  { %3161 = vmatpush3.msra.mxu0 %v4452_v46  ;;  %v3692_v42 = vpack.c.bf16 %v730_v41, %v729_v40  ;;  %v913_v40 = vld [vmem:[#allocation5 + $0x270] sm:$0xff] }
 0x1a5   :  { %3163 = vmatmul.mubr.msk.f32.vlgmr.msra.gmra.mrb[10].mxu0 %vm546_vm8, %v451_v36  ;;  %3646 = vmatprep.subr.bf16.mxu0 %v4315_v1  ;;  %v545_v36 = vmul.f32 %v544_v35, %v4452_v46  ;;  %v814_v46 = vld [vmem:[#allocation5 + $0x188] sm:$0xff]  ;;  %v3737_v35 = vpack.c.bf16 %v911_v33, %v910_v29  ;;  %v1082_v29 = vld [vmem:[#allocation5 + $0x358] sm:$0xff]  ;;  %v3761_v33 = vpack.c.bf16 %v997_v28, %v996_v27 }
 0x1a6   :  { %3648 = vmatpush3.bf16.msra.mxu0 %v3647_v45  ;;  %3197 = vmatprep.mubr.msk.f32.mxu0 %vm4316_vm0, %v4317_v2  ;;  %v813_v45 = vld [vmem:[#allocation5 + $0x180] sm:$0xff] }
 0x1a7   :  { %3649 = vmatprep.subr.bf16.mxu0 %v4315_v1  ;;  %3693 = vmatpush3.bf16.msra.mxu1 %v3692_v42  ;;  %v3695_v48 = vpack.c.bf16 %v813_v45, %v812_v44  ;;  %v2768_v42 = vld [vmem:[#allocation5 + $0x130] ss:$0 sm:$0xff] }
 0x1a8   :  { %3718 = vmatprep.subr.bf16.mxu1 %v4315_v1 }
 0x1aa   :  { %3651 = vmatpush3.bf16.msra.mxu0 %v3650_v49  ;;  %v815_v49 = vld [vmem:[#allocation5 + $0x190] sm:$0xff] }
 0x1ab   :  { %3652 = vmatprep.subr.bf16.mxu0 %v4315_v1  ;;  %v3698_v50 = vpack.c.bf16 %v815_v49, %v814_v46  ;;  %v985_v49 = vld [vmem:[#allocation5 + $0x280] sm:$0xff] }
 0x1ae   :  { %3654 = vmatpush3.bf16.msra.mxu0 %v3653_v52  ;;  %v817_v52 = vld [vmem:[#allocation5 + $0x1a0] sm:$0xff] }
 0x1af   :  { %3655 = vmatprep.subr.bf16.mxu0 %v4315_v1  ;;  %v3701_v53 = vpack.c.bf16 %v817_v52, %v816_v51  ;;  %v1071_v51 = vld [vmem:[#allocation5 + $0x300] sm:$0xff] }
 0x1b2   :  { %3657 = vmatpush3.bf16.msra.mxu0 %v3656_v55  ;;  %v819_v55 = vld [vmem:[#allocation5 + $0x1b0] sm:$0xff] }
 0x1b3   :  { %3658 = vmatprep.subr.bf16.mxu0 %v4315_v1  ;;  %v3704_v56 = vpack.c.bf16 %v819_v55, %v818_v54 }
 0x1b6   :  { %3660 = vmatpush3.bf16.msra.mxu0 %v3659_v58  ;;  %v821_v58 = vld [vmem:[#allocation5 + $0x1c0] sm:$0xff] }
 0x1b7   :  { %3661 = vmatprep.subr.bf16.mxu0 %v4315_v1  ;;  %v3707_v59 = vpack.c.bf16 %v821_v58, %v820_v57  ;;  %v987_v57 = vld [vmem:[#allocation5 + $0x290] sm:$0xff]  ;;  %v1072_v58 = vld [vmem:[#allocation5 + $0x308] sm:$0xff] }
 0x1ba   :  { %3663 = vmatpush3.bf16.msra.mxu0 %v3662_v61  ;;  %v823_v61 = vld [vmem:[#allocation5 + $0x1d0] sm:$0xff] }
 0x1bb   :  { %3664 = vmatprep.subr.bf16.mxu0 %v4315_v1  ;;  %v3710_v62 = vpack.c.bf16 %v823_v61, %v822_v60 }
 0x1be   :  { %3666 = vmatpush3.bf16.msra.mxu0 %v3665_v0 }
 0x1bf   :  { %3667 = vmatprep.subr.bf16.mxu0 %v4315_v1 }
 0x1c2   :  { %3669 = vmatpush3.bf16.msra.mxu0 %v3668_v5 }
 0x1c3   :  { %3694 = vmatprep.subr.bf16.mxu0 %v4315_v1 }
 0x278   :  { %v616_v37 = vpop.f32.mrb[10].mxu0 }
 0x279   :  { %v620_v38 = vadd.f32 %v616_v37, %v545_v36  ;;  %v3164_v39 = vpop.f32.mrb[11].mxu0  ;;  %v826_v36 = vld [vmem:[#allocation5 + $0x1e8] sm:$0xff]  ;;  %v827_v37 = vld [vmem:[#allocation5 + $0x1f0] sm:$0xff] }
 0x27a   :  { %v3716_v39 = vpack.c.bf16 %v827_v37, %v826_v36  ;;  %v998_v36 = vld [vmem:[#allocation5 + $0x2e8] sm:$0xff]  ;;  %v999_v37 = vld [vmem:[#allocation5 + $0x2f0] sm:$0xff] }
 0x27b   :  { %3198 = vmatmul.mubr.f32.vlgmr.msra.gmra.mrb[12].mxu0 %v620_v38  ;;  %v912_v38 = vld [vmem:[#allocation5 + $0x268] sm:$0xff] }
 0x27c   :  { %3267 = vmatprep.mubr.msk.f32.mxu0 %vm4316_vm0, %v4317_v2  ;;  %3696 = vmatpush3.bf16.msra.mxu0 %v3695_v48  ;;  %v3740_v41 = vpack.c.bf16 %v913_v40, %v912_v38  ;;  %v984_v48 = vld [vmem:[#allocation5 + $0x278] sm:$0xff]  ;;  %v1084_v38 = vld [vmem:[#allocation5 + $0x368] sm:$0xff]  ;;  %v3764_v40 = vpack.c.bf16 %v999_v37, %v998_v36 }
 0x27d   :  { %3697 = vmatprep.subr.bf16.mxu0 %v4315_v1  ;;  %v3743_v54 = vpack.c.bf16 %v985_v49, %v984_v48  ;;  %v1184_v48 = vld [vmem:[#allocation5 + $0x398] sm:$0xff]  ;;  %v1185_v49 = vld [vmem:[#allocation5 + $0x3a0] sm:$0xff] }
 0x27e   :  { %v2769_v37 = vld [vmem:[#allocation5 + $0x378] ss:$0 sm:$0xff] }
 0x280   :  { %3699 = vmatpush3.bf16.msra.mxu0 %v3698_v50  ;;  %v1070_v50 = vld [vmem:[#allocation5 + $0x2f8] sm:$0xff] }
 0x281   :  { %3700 = vmatprep.subr.bf16.mxu0 %v4315_v1  ;;  %v3767_v55 = vpack.c.bf16 %v1071_v51, %v1070_v50  ;;  %v1186_v50 = vld [vmem:[#allocation5 + $0x3a8] sm:$0xff] }
 0x282   :  { %v3798_v51 = vpack.c.bf16 %v1186_v50, %v1185_v49 }
 0x284   :  { %3702 = vmatpush3.bf16.msra.mxu0 %v3701_v53 }
 0x285   :  { %3703 = vmatprep.subr.bf16.mxu0 %v4315_v1 }
 0x288   :  { %3705 = vmatpush3.bf16.msra.mxu0 %v3704_v56  ;;  %v986_v56 = vld [vmem:[#allocation5 + $0x288] sm:$0xff] }
 0x289   :  { %3706 = vmatprep.subr.bf16.mxu0 %v4315_v1  ;;  %v3746_v61 = vpack.c.bf16 %v987_v57, %v986_v56  ;;  %v1190_v56 = vld [vmem:[#allocation5 + $0x3c8] sm:$0xff] }
 0x28c   :  { %3708 = vmatpush3.bf16.msra.mxu0 %v3707_v59  ;;  %v1073_v59 = vld [vmem:[#allocation5 + $0x310] sm:$0xff] }
 0x28d   :  { %3709 = vmatprep.subr.bf16.mxu0 %v4315_v1 }
 0x290   :  { %3711 = vmatpush3.bf16.msra.mxu0 %v3710_v62  ;;  %v3770_v62 = vpack.c.bf16 %v1073_v59, %v1072_v58  ;;  %v1191_v58 = vld [vmem:[#allocation5 + $0x3d0] sm:$0xff]  ;;  %v1192_v59 = vld [vmem:[#allocation5 + $0x3d8] sm:$0xff] }
 0x291   :  { %3712 = vmatprep.subr.bf16.mxu0 %v4315_v1 }
 0x294   :  { %3714 = vmatpush3.bf16.msra.mxu0 %v3713_v31  ;;  %v1083_v31 = vld [vmem:[#allocation5 + $0x360] sm:$0xff] }
 0x295   :  { %3715 = vmatprep.subr.bf16.mxu0 %v4315_v1 }
 0x298   :  { %3717 = vmatpush3.bf16.msra.mxu0 %v3716_v39  ;;  %v1085_v39 = vld [vmem:[#allocation5 + $0x370] sm:$0xff] }
 0x299   :  { %3742 = vmatprep.subr.bf16.mxu0 %v4315_v1 }
 0x34e   :  { %v708_v0 = vpop.f32.mrb[12].mxu0 }
 0x34f   :  { %v709_v5 = vadd.f32 %v2767_v63, %v708_v0  ;;  %v3199_v6 = vpop.f32.mrb[13].mxu0  ;;  %v988_v63 = vld [vmem:[#allocation5 + $0x298] sm:$0xff]  ;;  %v989_v0 = vld [vmem:[#allocation5 + $0x2a0] sm:$0xff] }
 0x350   :  { %v3773_v6 = vpack.c.bf16 %v1075_v4, %v1074_v3  ;;  %v1196_v3 = vld [vmem:[#allocation5 + $0x3f8] sm:$0xff] }
 0x351   :  { %vm712_vm9 = vcmp.ge.f32.partialorder %v709_v5, 0.0  ;;  %v713_v7 = vmul.f32 0.01, %v709_v5 }
 0x353   :  { %v714_v12 = vsel %vm712_vm9, %v709_v5, %v713_v7  ;;  %v3749_v5 = vpack.c.bf16 %v989_v0, %v988_v63  ;;  %v990_v7 = vld [vmem:[#allocation5 + $0x2a8] sm:$0xff]  ;;  %v1195_v0 = vld [vmem:[#allocation5 + $0x3f0] sm:$0xff] }
 0x354   :  { %3233 = vmatmul.mubr.f32.vlgmr.msra.gmra.mrb[2].mxu1 %v714_v12  ;;  %v3818_v4 = vpack.c.bf16 %v1196_v3, %v1195_v0 }
 0x355   :  { %3720 = vmatpush3.bf16.msra.mxu1 %v3719_v8  ;;  %3302 = vmatprep.mubr.msk.f32.mxu1 %vm4316_vm0, %v4317_v2  ;;  %v991_v8 = vld [vmem:[#allocation5 + $0x2b0] sm:$0xff] }
 0x356   :  { %3721 = vmatprep.subr.bf16.mxu1 %v4315_v1  ;;  %v3752_v12 = vpack.c.bf16 %v991_v8, %v990_v7  ;;  %v1200_v7 = vld [vmem:[#allocation5 + $0x418] sm:$0xff] }
 0x359   :  { %3723 = vmatpush3.bf16.msra.mxu1 %v3722_v13  ;;  %v3776_v13 = vpack.c.bf16 %v1077_v11, %v1076_v9  ;;  %v1201_v9 = vld [vmem:[#allocation5 + $0x420] sm:$0xff] }
 0x35a   :  { %3724 = vmatprep.subr.bf16.mxu1 %v4315_v1  ;;  %v3826_v11 = vpack.c.bf16 %v1201_v9, %v1200_v7 }
 0x35d   :  { %3726 = vmatpush3.bf16.msra.mxu1 %v3725_v17  ;;  %v1078_v17 = vld [vmem:[#allocation5 + $0x338] sm:$0xff] }
 0x35e   :  { %3727 = vmatprep.subr.bf16.mxu1 %v4315_v1 }
 0x361   :  { %3729 = vmatpush3.bf16.msra.mxu1 %v3728_v21  ;;  %v3779_v21 = vpack.c.bf16 %v1079_v19, %v1078_v17  ;;  %v1205_v17 = vld [vmem:[#allocation5 + $0x440] sm:$0xff] }
 0x362   :  { %3730 = vmatprep.subr.bf16.mxu1 %v4315_v1  ;;  %v3834_v19 = vpack.c.bf16 %v1205_v17, %v1204_v15 }
 0x365   :  { %3732 = vmatpush3.bf16.msra.mxu1 %v3731_v10  ;;  %v1080_v10 = vld [vmem:[#allocation5 + $0x348] sm:$0xff] }
 0x366   :  { %3733 = vmatprep.subr.bf16.mxu1 %v4315_v1 }
 0x369   :  { %3735 = vmatpush3.bf16.msra.mxu1 %v3734_v26  ;;  %v3782_v26 = vpack.c.bf16 %v1081_v24, %v1080_v10  ;;  %v1209_v10 = vld [vmem:[#allocation5 + $0x460] sm:$0xff] }
 0x36a   :  { %3736 = vmatprep.subr.bf16.mxu1 %v4315_v1  ;;  %v3842_v24 = vpack.c.bf16 %v1209_v10, %v1208_v23 }
 0x36d   :  { %3738 = vmatpush3.bf16.msra.mxu1 %v3737_v35  ;;  %v3785_v35 = vpack.c.bf16 %v1083_v31, %v1082_v29 }
 0x36e   :  { %3739 = vmatprep.subr.bf16.mxu1 %v4315_v1 }
 0x371   :  { %3741 = vmatpush3.bf16.msra.mxu1 %v3740_v41  ;;  %v3788_v41 = vpack.c.bf16 %v1085_v39, %v1084_v38 }
 0x372   :  { %3766 = vmatprep.subr.bf16.mxu1 %v4315_v1 }
 0x427   :  { %v802_v44 = vpop.f32.mrb[2].mxu1 }
 0x428   :  { %v803_v45 = vadd.f32 %v2768_v42, %v802_v44  ;;  %v3234_v47 = vpop.f32.mrb[3].mxu1  ;;  %v1181_v42 = vld [vmem:[#allocation5 + $0x380] sm:$0xff]  ;;  %v1182_v44 = vld [vmem:[#allocation5 + $0x388] sm:$0xff] }
 0x429   :  { %v3790_v47 = vpack.c.bf16 %v1182_v44, %v1181_v42 }
 0x42a   :  { %vm806_vm10 = vcmp.ge.f32.partialorder %v803_v45, 0.0  ;;  %v807_v46 = vmul.f32 0.01, %v803_v45 }
 0x42c   :  { %v808_v52 = vsel %vm806_vm10, %v803_v45, %v807_v46  ;;  %v1183_v45 = vld [vmem:[#allocation5 + $0x390] sm:$0xff] }
 0x42d   :  { %v810_v53 = vmul.f32 0.01, %v808_v52  ;;  %vm809_vm11 = vcmp.ge.f32.partialorder %v808_v52, 0.0  ;;  %v3794_v46 = vpack.c.bf16 %v1184_v48, %v1183_v45 }
 0x42f   :  { %v4505_v60 = vsel %vm809_vm11, %v808_v52, %v810_v53  ;;  %v1187_v52 = vld [vmem:[#allocation5 + $0x3b0] sm:$0xff]  ;;  %v1188_v53 = vld [vmem:[#allocation5 + $0x3b8] sm:$0xff] }
 0x430   :  { %3268 = vmatmul.mubr.f32.vlgmr.msra.gmra.mrb[14].mxu0 %v4505_v60  ;;  %3303 = vmatmul.mubr.f32.vlgmr.msra.gmra.mrb[4].mxu1 %v4505_v60 }
 0x431   :  { %3744 = vmatpush3.bf16.msra.mxu0 %v3743_v54  ;;  %3768 = vmatpush3.bf16.msra.mxu1 %v3767_v55  ;;  %v3802_v54 = vpack.c.bf16 %v1188_v53, %v1187_v52  ;;  %v1189_v55 = vld [vmem:[#allocation5 + $0x3c0] sm:$0xff] }
 0x432   :  { %3745 = vmatprep.subr.bf16.mxu0 %v4315_v1  ;;  %3769 = vmatprep.subr.bf16.mxu1 %v4315_v1  ;;  %v3806_v57 = vpack.c.bf16 %v1190_v56, %v1189_v55 }
 0x433   :  { %3337 = vmatprep.mubr.msk.f32.mxu0 %vm4316_vm0, %v4317_v2  ;;  %3372 = vmatprep.mubr.msk.f32.mxu1 %vm4316_vm0, %v4317_v2 }
 0x435   :  { %3747 = vmatpush3.bf16.msra.mxu0 %v3746_v61  ;;  %3771 = vmatpush3.bf16.msra.mxu1 %v3770_v62  ;;  %v1193_v61 = vld [vmem:[#allocation5 + $0x3e0] sm:$0xff]  ;;  %v1194_v62 = vld [vmem:[#allocation5 + $0x3e8] sm:$0xff] }
 0x436   :  { %3748 = vmatprep.subr.bf16.mxu0 %v4315_v1  ;;  %3772 = vmatprep.subr.bf16.mxu1 %v4315_v1  ;;  %v3814_v63 = vpack.c.bf16 %v1194_v62, %v1193_v61  ;;  %v1213_v61 = vld [vmem:[#allocation5 + $0x480] sm:$0xff] }
 0x439   :  { %3750 = vmatpush3.bf16.msra.mxu0 %v3749_v5  ;;  %3774 = vmatpush3.bf16.msra.mxu1 %v3773_v6  ;;  %v1198_v5 = vld [vmem:[#allocation5 + $0x408] sm:$0xff]  ;;  %v1199_v6 = vld [vmem:[#allocation5 + $0x410] sm:$0xff] }
 0x43a   :  { %3751 = vmatprep.subr.bf16.mxu0 %v4315_v1  ;;  %3775 = vmatprep.subr.bf16.mxu1 %v4315_v1  ;;  %v3822_v8 = vpack.c.bf16 %v1199_v6, %v1198_v5 }
 0x43d   :  { %3753 = vmatpush3.bf16.msra.mxu0 %v3752_v12  ;;  %3777 = vmatpush3.bf16.msra.mxu1 %v3776_v13  ;;  %v1202_v12 = vld [vmem:[#allocation5 + $0x428] sm:$0xff]  ;;  %v1203_v13 = vld [vmem:[#allocation5 + $0x430] sm:$0xff] }
 0x43e   :  { %3754 = vmatprep.subr.bf16.mxu0 %v4315_v1  ;;  %3778 = vmatprep.subr.bf16.mxu1 %v4315_v1  ;;  %v3830_v14 = vpack.c.bf16 %v1203_v13, %v1202_v12 }
 0x441   :  { %3756 = vmatpush3.bf16.msra.mxu0 %v3755_v20  ;;  %3780 = vmatpush3.bf16.msra.mxu1 %v3779_v21  ;;  %v1206_v20 = vld [vmem:[#allocation5 + $0x448] sm:$0xff]  ;;  %v1207_v21 = vld [vmem:[#allocation5 + $0x450] sm:$0xff] }
 0x442   :  { %3757 = vmatprep.subr.bf16.mxu0 %v4315_v1  ;;  %3781 = vmatprep.subr.bf16.mxu1 %v4315_v1  ;;  %v3838_v22 = vpack.c.bf16 %v1207_v21, %v1206_v20 }
 0x445   :  { %3759 = vmatpush3.bf16.msra.mxu0 %v3758_v25  ;;  %3783 = vmatpush3.bf16.msra.mxu1 %v3782_v26  ;;  %v1210_v25 = vld [vmem:[#allocation5 + $0x468] sm:$0xff]  ;;  %v1211_v26 = vld [vmem:[#allocation5 + $0x470] sm:$0xff] }
 0x446   :  { %3760 = vmatprep.subr.bf16.mxu0 %v4315_v1  ;;  %3784 = vmatprep.subr.bf16.mxu1 %v4315_v1  ;;  %v3846_v27 = vpack.c.bf16 %v1211_v26, %v1210_v25 }
 0x449   :  { %3762 = vmatpush3.bf16.msra.mxu0 %v3761_v33  ;;  %3786 = vmatpush3.bf16.msra.mxu1 %v3785_v35 }
 0x44a   :  { %3763 = vmatprep.subr.bf16.mxu0 %v4315_v1  ;;  %3787 = vmatprep.subr.bf16.mxu1 %v4315_v1 }
 0x44d   :  { %3765 = vmatpush3.bf16.msra.mxu0 %v3764_v40  ;;  %3789 = vmatpush3.bf16.msra.mxu1 %v3788_v41 }
 0x44e   :  { %3791 = vmatprep.subr.bf16.mxu0 %v3790_v47  ;;  %3823 = vmatprep.subr.bf16.mxu1 %v3822_v8 }
 0x450   :  { %3338 = vmatmul.mubr.f32.vlgmr.msra.gmra.mrb[16].mxu0 %v4505_v60  ;;  %3373 = vmatmul.mubr.f32.vlgmr.msra.gmra.mrb[6].mxu1 %v4505_v60  ;;  %v3810_v60 = vpack.c.bf16 %v1192_v59, %v1191_v58 }
 0x451   :  { %3793 = vmatpush3.bf16.msra.mxu0 %v3790_v47  ;;  %3825 = vmatpush3.bf16.msra.mxu1 %v3822_v8  ;;  %v2771_v8 = vld [vmem:[#allocation5 + $0x488] ss:$0 sm:$0xff] }
 0x452   :  { %3795 = vmatprep.subr.bf16.mxu0 %v3794_v46  ;;  %3827 = vmatprep.subr.bf16.mxu1 %v3826_v11 }
 0x455   :  { %3797 = vmatpush3.bf16.msra.mxu0 %v3794_v46  ;;  %3829 = vmatpush3.bf16.msra.mxu1 %v3826_v11 }
 0x456   :  { %3799 = vmatprep.subr.bf16.mxu0 %v3798_v51  ;;  %3831 = vmatprep.subr.bf16.mxu1 %v3830_v14 }
 0x459   :  { %3801 = vmatpush3.bf16.msra.mxu0 %v3798_v51  ;;  %3833 = vmatpush3.bf16.msra.mxu1 %v3830_v14 }
 0x45a   :  { %3803 = vmatprep.subr.bf16.mxu0 %v3802_v54  ;;  %3835 = vmatprep.subr.bf16.mxu1 %v3834_v19 }
 0x45d   :  { %3805 = vmatpush3.bf16.msra.mxu0 %v3802_v54  ;;  %3837 = vmatpush3.bf16.msra.mxu1 %v3834_v19 }
 0x45e   :  { %3807 = vmatprep.subr.bf16.mxu0 %v3806_v57  ;;  %3839 = vmatprep.subr.bf16.mxu1 %v3838_v22 }
 0x461   :  { %3809 = vmatpush3.bf16.msra.mxu0 %v3806_v57  ;;  %3841 = vmatpush3.bf16.msra.mxu1 %v3838_v22 }
 0x462   :  { %3811 = vmatprep.subr.bf16.mxu0 %v3810_v60  ;;  %3843 = vmatprep.subr.bf16.mxu1 %v3842_v24 }
 0x465   :  { %3813 = vmatpush3.bf16.msra.mxu0 %v3810_v60  ;;  %3845 = vmatpush3.bf16.msra.mxu1 %v3842_v24 }
 0x466   :  { %3815 = vmatprep.subr.bf16.mxu0 %v3814_v63  ;;  %3847 = vmatprep.subr.bf16.mxu1 %v3846_v27 }
 0x469   :  { %3817 = vmatpush3.bf16.msra.mxu0 %v3814_v63  ;;  %3849 = vmatpush3.bf16.msra.mxu1 %v3846_v27  ;;  %v2770_v63 = vld [vmem:[#allocation5 + $0x400] ss:$0 sm:$0xff]  ;;  %v1393_v27 = vld [vmem:[#allocation5 + $0x490] sm:$0xff] }
 0x46a   :  { %3819 = vmatprep.subr.bf16.mxu0 %v3818_v4 }
 0x46d   :  { %3821 = vmatpush3.bf16.msra.mxu0 %v3818_v4 }
 0x503   :  { %v894_v28 = vpop.f32.mrb[14].mxu0  ;;  %v980_v29 = vpop.f32.mrb[4].mxu1 }
 0x504   :  { %v1156_v31 = vadd.f32 %v894_v28, %v4446_v30  ;;  %v1157_v33 = vadd.f32 %v980_v29, %v4448_v32  ;;  %v3269_v35 = vpop.f32.mrb[15].mxu0  ;;  %v3304_v36 = vpop.f32.mrb[5].mxu1 }
 0x506   :  { %v1165_v38 = vadd.f32 %v2769_v37, %v1156_v31  ;;  %v1166_v39 = vadd.f32 %v2769_v37, %v1157_v33 }
 0x508   :  { %v1173_v40 = vmul.f32 0.01, %v1165_v38  ;;  %v1174_v41 = vmul.f32 0.01, %v1166_v39  ;;  %vm1169_vm12 = vcmp.ge.f32.partialorder %v1165_v38, 0.0  ;;  %vm1170_vm13 = vcmp.ge.f32.partialorder %v1166_v39, 0.0 }
 0x50a   :  { %v1177_v30 = vsel %vm1169_vm12, %v1165_v38, %v1173_v40  ;;  %v1178_v49 = vsel %vm1170_vm13, %v1166_v39, %v1174_v41 }
 0x50b   :  { %v1215_v53 = vadd.f32 %v1178_v49, %v1177_v30  ;;  %v1216_v54 = vmax.f32 %v1177_v30, %v1178_v49 }
 0x523   :  { %v1066_v42 = vpop.f32.mrb[16].mxu0  ;;  %v1152_v44 = vpop.f32.mrb[6].mxu1 }
 0x524   :  { %v1158_v45 = vadd.f32 %v1066_v42, %v4450_v34  ;;  %v1159_v47 = vadd.f32 %v1152_v44, %v4485_v43  ;;  %v3339_v48 = vpop.f32.mrb[17].mxu0  ;;  %v3374_v46 = vpop.f32.mrb[7].mxu1  ;;  %v1212_v43 = vld [vmem:[#allocation5 + $0x478] sm:$0xff] }
 0x525   :  { %v3850_v62 = vpack.c.bf16 %v1213_v61, %v1212_v43  ;;  %v1394_v46 = vld [vmem:[#allocation5 + $0x498] sm:$0xff] }
 0x526   :  { %v1167_v32 = vadd.f32 %v2769_v37, %v1158_v45  ;;  %v1168_v50 = vadd.f32 %v2769_v37, %v1159_v47  ;;  %v1582_v43 = vld [vmem:[#allocation5 + $0x578] sm:$0xff] }
 0x527   :  { %3851 = vmatprep.subr.bf16.mxu1 %v3850_v62 }
 0x528   :  { %vm1171_vm14 = vcmp.ge.f32.partialorder %v1167_v32, 0.0  ;;  %v1175_v51 = vmul.f32 0.01, %v1167_v32  ;;  %v1176_v52 = vmul.f32 0.01, %v1168_v50  ;;  %vm1172_vm15 = vcmp.ge.f32.partialorder %v1168_v50, 0.0  ;;  %3853 = vmatpush3.bf16.msra.mxu1 %v3850_v62 }
 0x529   :  { %v1583_v62 = vld [vmem:[#allocation5 + $0x580] sm:$0xff] }
 0x52a   :  { %v1179_v55 = vsel %vm1171_vm14, %v1167_v32, %v1175_v51  ;;  %v1180_v58 = vsel %vm1172_vm15, %v1168_v50, %v1176_v52  ;;  %v1573_v32 = vld [vmem:[#allocation5 + $0x530] sm:$0xff]  ;;  %v1574_v50 = vld [vmem:[#allocation5 + $0x538] sm:$0xff]  ;;  %v1575_v51 = vld [vmem:[#allocation5 + $0x540] sm:$0xff] }
 0x52b   :  { %v1217_v56 = vadd.f32 %v1215_v53, %v1179_v55  ;;  %v1218_v57 = vmax.f32 %v1216_v54, %v1179_v55  ;;  %v3870_v52 = vpack.c.bf16 %v1574_v50, %v1573_v32  ;;  %v1576_v53 = vld [vmem:[#allocation5 + $0x548] sm:$0xff]  ;;  %v1759_v32 = vld [vmem:[#allocation5 + $0x5f0] sm:$0xff] }
 0x52c   :  { %v3874_v54 = vpack.c.bf16 %v1576_v53, %v1575_v51  ;;  %v1760_v51 = vld [vmem:[#allocation5 + $0x5f8] sm:$0xff] }
 0x52d   :  { %v1219_v59 = vadd.f32 %v1217_v56, %v1180_v58  ;;  %v1220_v60 = vmax.f32 %v1218_v57, %v1180_v58  ;;  %v1578_v56 = vld [vmem:[#allocation5 + $0x558] sm:$0xff]  ;;  %3871 = vmatprep.subr.bf16.mxu1 %v3870_v52 }
 0x52f   :  { %v1221_v34 = vmul.f32 0.25, %v1219_v59  ;;  %v1580_v59 = vld [vmem:[#allocation5 + $0x568] sm:$0xff] }
 0x531   :  { %3407 = vmatprep.mubr.f32.mxu0 %v1221_v34 }
 0x532   :  { %3408 = vmatmul.mubr.f32.vlgmr.msra.gmra.mrb[18].mxu0 %v1220_v60  ;;  %v1581_v60 = vld [vmem:[#allocation5 + $0x570] sm:$0xff] }
 0x533   :  { %3461 = vmatprep.mubr.f32.mxu0 %v1393_v27  ;;  %v3886_v61 = vpack.c.bf16 %v1582_v43, %v1581_v60 }
 0x605   :  { %v3409_v0 = vpop.f32.mrb[18].mxu0 }
 0x606   :  { %v1298_v3 = vadd.f32 %v3409_v0, %v2770_v63  ;;  %v1292_v4 = vpop.f32.mrb[19].mxu0 }
 0x607   :  { %v1293_v5 = vadd.f32 %v2770_v63, %v1292_v4  ;;  %v1584_v63 = vld [vmem:[#allocation5 + $0x588] sm:$0xff]  ;;  %v1586_v4 = vld [vmem:[#allocation5 + $0x598] sm:$0xff] }
 0x608   :  { %v1302_v7 = vmax.f32 %v1298_v3, 0.0  ;;  %v3890_v0 = vpack.c.bf16 %v1584_v63, %v1583_v62  ;;  %v1585_v3 = vld [vmem:[#allocation5 + $0x590] sm:$0xff]  ;;  %v1562_v62 = vld [vmem:[#allocation5 + $0x4d8] sm:$0xff] }
 0x609   :  { %v1301_v6 = vmax.f32 %v1293_v5, 0.0  ;;  %v3894_v5 = vpack.c.bf16 %v1586_v4, %v1585_v3  ;;  %v1564_v3 = vld [vmem:[#allocation5 + $0x4e8] sm:$0xff]  ;;  %v1565_v4 = vld [vmem:[#allocation5 + $0x4f0] sm:$0xff] }
 0x60b   :  { %3442 = vmatprep.mubr.f32.mxu1 %v1301_v6 }
 0x60c   :  { %3443 = vmatmul.mubr.f32.vlgmr.msra.gmra.mrb[8].mxu1 %v1302_v7 }
 0x60d   :  { %3873 = vmatpush3.bf16.msra.mxu1 %v3870_v52  ;;  %v1761_v52 = vld [vmem:[#allocation5 + $0x600] sm:$0xff] }
 0x60e   :  { %3875 = vmatprep.subr.bf16.mxu1 %v3874_v54  ;;  %v3950_v53 = vpack.c.bf16 %v1761_v52, %v1760_v51  ;;  %v1775_v52 = vld [vmem:[#allocation5 + $0x670] sm:$0xff] }
 0x611   :  { %3877 = vmatpush3.bf16.msra.mxu1 %v3874_v54 }
 0x6df   :  { %v3444_v9 = vpop.f32.mrb[8].mxu1 }
 0x6e0   :  { %v1379_v11 = vadd.f32 %v3444_v9, %v2771_v8  ;;  %v1373_v12 = vpop.f32.mrb[9].mxu1 }
 0x6e1   :  { %v1374_v13 = vadd.f32 %v2771_v8, %v1373_v12 }
 0x6e3   :  { %v1382_v14 = vadd.f32 %v1379_v11, %v1374_v13 }
 0x6e5   :  { %v2772_v15 = vmul.f32 -1.442695, %v1382_v14 }
 0x6e7   :  { %4193 = vpow2.f32 %v2772_v15 }
 0x6f1   :  { %v4194_v17 = vpop.eup %4193 }
 0x6f2   :  { %v1386_v19 = vadd.f32 1.0, %v4194_v17 }
 0x6f4   :  { %4195 = vrcp.f32 %v1386_v19 }
 0x6fe   :  { %v4196_v20 = vpop.eup %4195 }
 0x6ff   :  { %v4534_v21 = vmul.f32 %v4196_v20, %v1179_v55  ;;  %v4536_v22 = vmul.f32 %v4196_v20, %v1177_v30  ;;  %v4540_v24 = vmul.f32 %v4196_v20, %v1178_v49  ;;  %v4544_v26 = vmul.f32 %v4196_v20, %v1180_v58  ;;  %v1395_v30 = vld [vmem:[#allocation5 + $0x4a0] sm:$0xff]  ;;  %v1396_v49 = vld [vmem:[#allocation5 + $0x4a8] sm:$0xff]  ;;  %v1577_v55 = vld [vmem:[#allocation5 + $0x550] sm:$0xff] }
 0x700   :  { %v3878_v57 = vpack.c.bf16 %v1578_v56, %v1577_v55  ;;  %v1579_v58 = vld [vmem:[#allocation5 + $0x560] sm:$0xff] }
 0x701   :  { %v1402_v23 = vsel %vm1397_vm1, %v4534_v21, -1e+30  ;;  %v1400_v10 = vsel %vm1397_vm1, %v4536_v22, -1e+30  ;;  %v1401_v25 = vsel %vm1397_vm1, %v4540_v24, -1e+30  ;;  %v3882_v34 = vpack.c.bf16 %v1580_v59, %v1579_v58 }
 0x702   :  { %1408 = vmax.xlane.f32.xlu0 %v1402_v23  ;;  %1404 = vmax.xlane.f32.xlu1 %v1400_v10  ;;  %v1403_v18 = vsel %vm1397_vm1, %v4544_v26, -1e+30  ;;  %v1559_v56 = vld [vmem:[#allocation5 + $0x4c0] sm:$0xff] }
 0x703   :  { %3879 = vmatprep.subr.bf16.mxu1 %v3878_v57 }
 0x704   :  { %3881 = vmatpush3.bf16.msra.mxu1 %v3878_v57  ;;  %v1560_v57 = vld [vmem:[#allocation5 + $0x4c8] sm:$0xff] }
 0x705   :  { %3883 = vmatprep.subr.bf16.mxu1 %v3882_v34  ;;  %v3906_v43 = vpack.c.bf16 %v1560_v57, %v1559_v56  ;;  %v1778_v56 = vld [vmem:[#allocation5 + $0x688] sm:$0xff] }
 0x706   :  { %1406 = vmax.xlane.f32.xlu1 %v1401_v25 }
 0x708   :  { %3885 = vmatpush3.bf16.msra.mxu1 %v3882_v34 }
 0x709   :  { %3887 = vmatprep.subr.bf16.mxu1 %v3886_v61 }
 0x70a   :  { %1412 = vadd.xlane.f32.xlu1 %v4536_v22 }
 0x70c   :  { %3889 = vmatpush3.bf16.msra.mxu1 %v3886_v61  ;;  %v1561_v61 = vld [vmem:[#allocation5 + $0x4d0] sm:$0xff] }
 0x70d   :  { %3891 = vmatprep.subr.bf16.mxu1 %v3890_v0  ;;  %v3910_v63 = vpack.c.bf16 %v1562_v62, %v1561_v61  ;;  %v1783_v62 = vld [vmem:[#allocation5 + $0x6b0] sm:$0xff] }
 0x70e   :  { %1414 = vadd.xlane.f32.xlu1 %v4540_v24 }
 0x710   :  { %3893 = vmatpush3.bf16.msra.mxu1 %v3890_v0  ;;  %v1563_v0 = vld [vmem:[#allocation5 + $0x4e0] sm:$0xff] }
 0x711   :  { %3895 = vmatprep.subr.bf16.mxu1 %v3894_v5 }
 0x712   :  { %1410 = vmax.xlane.f32.xlu1 %v1403_v18 }
 0x714   :  { %3897 = vmatpush3.bf16.msra.mxu1 %v3894_v5  ;;  %v1566_v5 = vld [vmem:[#allocation5 + $0x4f8] sm:$0xff] }
 0x716   :  { %1416 = vadd.xlane.f32.xlu1 %v4534_v21 }
 0x71a   :  { %1418 = vadd.xlane.f32.xlu1 %v4544_v26 }
 0x78f   :  { %v1405_v28 = vpop.xlane.xlu1 %1404  ;;  %v1409_v37 = vpop.xlane.xlu0 %1408 }
 0x793   :  { %v1407_v29 = vpop.xlane.xlu1 %1406 }
 0x794   :  { %v3854_v31 = vpack.c.bf16 %v1407_v29, %v1405_v28  ;;  %v1587_v28 = vld [vmem:[#allocation5 + $0x5a0] sm:$0xff]  ;;  %v1588_v29 = vld [vmem:[#allocation5 + $0x5a8] sm:$0xff] }
 0x796   :  { %3855 = vmatprep.subr.bf16.mxu0 %v3854_v31 }
 0x797   :  { %3857 = vmatpush3.bf16.msra.mxu0 %v3854_v31  ;;  %v1413_v33 = vpop.xlane.xlu1 %1412  ;;  %v3898_v31 = vpack.c.bf16 %v1588_v29, %v1587_v28  ;;  %v1767_v28 = vld [vmem:[#allocation5 + $0x630] sm:$0xff] }
 0x798   :  { %v1420_v39 = vmul.f32 0.015625, %v1413_v33 }
 0x799   :  { %3899 = vmatprep.subr.bf16.mxu1 %v3898_v31 }
 0x79a   :  { %3901 = vmatpush3.bf16.msra.mxu1 %v3898_v31  ;;  %v1769_v31 = vld [vmem:[#allocation5 + $0x640] sm:$0xff] }
 0x79b   :  { %v1415_v35 = vpop.xlane.xlu1 %1414 }
 0x79c   :  { %v1421_v36 = vmul.f32 0.015625, %v1415_v35 }
 0x79e   :  { %v3862_v41 = vpack.c.bf16 %v1421_v36, %v1420_v39  ;;  %v1557_v36 = vld [vmem:[#allocation5 + $0x4b0] sm:$0xff] }
 0x79f   :  { %v1411_v38 = vpop.xlane.xlu1 %1410 }
 0x7a0   :  { %v3858_v40 = vpack.c.bf16 %v1411_v38, %v1409_v37  ;;  %v1558_v37 = vld [vmem:[#allocation5 + $0x4b8] sm:$0xff] }
 0x7a1   :  { %v3902_v38 = vpack.c.bf16 %v1558_v37, %v1557_v36 }
 0x7a2   :  { %3859 = vmatprep.subr.bf16.mxu0 %v3858_v40 }
 0x7a3   :  { %3861 = vmatpush3.bf16.msra.mxu0 %v3858_v40  ;;  %v1417_v42 = vpop.xlane.xlu1 %1416  ;;  %3903 = vmatprep.subr.bf16.mxu1 %v3902_v38  ;;  %v1752_v40 = vld [vmem:[#allocation5 + $0x5b8] sm:$0xff] }
 0x7a4   :  { %3863 = vmatprep.subr.bf16.mxu0 %v3862_v41  ;;  %v1422_v45 = vmul.f32 0.015625, %v1417_v42  ;;  %v1754_v42 = vld [vmem:[#allocation5 + $0x5c8] sm:$0xff] }
 0x7a7   :  { %3865 = vmatpush3.bf16.msra.mxu0 %v3862_v41  ;;  %v1419_v44 = vpop.xlane.xlu1 %1418  ;;  %v1753_v41 = vld [vmem:[#allocation5 + $0x5c0] sm:$0xff] }
 0x7a8   :  { %v1423_v47 = vmul.f32 0.015625, %v1419_v44  ;;  %v3934_v44 = vpack.c.bf16 %v1753_v41, %v1752_v40 }
 0x7aa   :  { %v3866_v48 = vpack.c.bf16 %v1423_v47, %v1422_v45  ;;  %v1755_v45 = vld [vmem:[#allocation5 + $0x5d0] sm:$0xff] }
 0x7ab   :  { %v3938_v47 = vpack.c.bf16 %v1755_v45, %v1754_v42 }
 0x7ac   :  { %3867 = vmatprep.subr.bf16.mxu0 %v3866_v48 }
 0x7ad   :  { %3869 = vmatpush3.bf16.msra.mxu0 %v3866_v48  ;;  %v1756_v48 = vld [vmem:[#allocation5 + $0x5d8] sm:$0xff] }
 0x7ae   :  { %3935 = vmatprep.subr.bf16.mxu0 %v3934_v44 }
 0x7b0   :  { %3462 = vmatmul.mubr.f32.vlgmr.msra.gmra.mrb[20].mxu0 %v1394_v46  ;;  %v1757_v46 = vld [vmem:[#allocation5 + $0x5e0] sm:$0xff] }
 0x7b1   :  { %3464 = vmatprep.mubr.f32.mxu0 %v1395_v30  ;;  %3937 = vmatpush3.bf16.msra.mxu0 %v3934_v44  ;;  %v3942_v30 = vpack.c.bf16 %v1757_v46, %v1756_v48  ;;  %v1772_v48 = vld [vmem:[#allocation5 + $0x658] sm:$0xff] }
 0x7b2   :  { %3939 = vmatprep.subr.bf16.mxu0 %v3938_v47 }
 0x7b4   :  { %3465 = vmatmul.mubr.f32.gmra.mrb[22].mxu0 %v1396_v49  ;;  %v1758_v49 = vld [vmem:[#allocation5 + $0x5e8] sm:$0xff] }
 0x7b5   :  { %3941 = vmatpush3.bf16.msra.mxu0 %v3938_v47  ;;  %v3946_v50 = vpack.c.bf16 %v1759_v32, %v1758_v49  ;;  %v1771_v47 = vld [vmem:[#allocation5 + $0x650] sm:$0xff]  ;;  %v1773_v32 = vld [vmem:[#allocation5 + $0x660] sm:$0xff] }
 0x7b6   :  { %3943 = vmatprep.subr.bf16.mxu0 %v3942_v30  ;;  %v3970_v49 = vpack.c.bf16 %v1772_v48, %v1771_v47  ;;  %v2105_v47 = vld [vmem:[#allocation7 + $0x120] sm:$0xff]  ;;  %v2107_v48 = vld [vmem:[#allocation7 + $0x130] sm:$0xff] }
 0x7b9   :  { %3945 = vmatpush3.bf16.msra.mxu0 %v3942_v30 }
 0x7ba   :  { %3947 = vmatprep.subr.bf16.mxu0 %v3946_v50 }
 0x7bd   :  { %3949 = vmatpush3.bf16.msra.mxu0 %v3946_v50  ;;  %v1774_v50 = vld [vmem:[#allocation5 + $0x668] sm:$0xff] }
 0x7be   :  { %3951 = vmatprep.subr.bf16.mxu0 %v3950_v53  ;;  %v3974_v51 = vpack.c.bf16 %v1774_v50, %v1773_v32  ;;  %v2109_v50 = vld [vmem:[#allocation7 + $0x140] sm:$0xff] }
 0x7c1   :  { %3953 = vmatpush3.bf16.msra.mxu0 %v3950_v53  ;;  %v1776_v53 = vld [vmem:[#allocation5 + $0x678] sm:$0xff] }
 0x883   :  { %v3463_v6 = vpop.f32.mrb[20].mxu0 }
 0x884   :  { %v2774_v7 = vmul.f32 -1.442695, %v3463_v6  ;;  %v1490_v8 = vpop.f32.mrb[21].mxu0  ;;  %v1567_v6 = vld [vmem:[#allocation5 + $0x500] sm:$0xff] }
 0x885   :  { %v2773_v9 = vmul.f32 -1.442695, %v1490_v8  ;;  %v1569_v8 = vld [vmem:[#allocation5 + $0x510] sm:$0xff] }
 0x886   :  { %4197 = vpow2.f32 %v2774_v7 }
 0x887   :  { %4199 = vpow2.f32 %v2773_v9  ;;  %v3466_v11 = vpop.f32.mrb[22].mxu0  ;;  %v1570_v9 = vld [vmem:[#allocation5 + $0x518] sm:$0xff] }
 0x888   :  { %v2776_v12 = vmul.f32 -1.442695, %v3466_v11  ;;  %v1500_v13 = vpop.f32.mrb[23].mxu0  ;;  %v3926_v11 = vpack.c.bf16 %v1570_v9, %v1569_v8 }
 0x889   :  { %v2775_v14 = vmul.f32 -1.442695, %v1500_v13  ;;  %v1572_v13 = vld [vmem:[#allocation5 + $0x528] sm:$0xff] }
 0x88a   :  { %4201 = vpow2.f32 %v2776_v12  ;;  %v1571_v12 = vld [vmem:[#allocation5 + $0x520] sm:$0xff] }
 0x88b   :  { %4203 = vpow2.f32 %v2775_v14  ;;  %v3930_v14 = vpack.c.bf16 %v1572_v13, %v1571_v12 }
 0x890   :  { %v4198_v15 = vpop.eup %4197 }
 0x891   :  { %v4200_v17 = vpop.eup %4199  ;;  %v1522_v19 = vadd.f32 1.0, %v4198_v15 }
 0x892   :  { %v1521_v20 = vadd.f32 1.0, %v4200_v17 }
 0x893   :  { %4205 = vrcp.f32 %v1522_v19  ;;  %v1762_v19 = vld [vmem:[#allocation5 + $0x608] sm:$0xff] }
 0x894   :  { %v4202_v23 = vpop.eup %4201  ;;  %4207 = vrcp.f32 %v1521_v20  ;;  %v1763_v20 = vld [vmem:[#allocation5 + $0x610] sm:$0xff] }
 0x895   :  { %v4204_v10 = vpop.eup %4203  ;;  %v1524_v25 = vadd.f32 1.0, %v4202_v23  ;;  %v3954_v23 = vpack.c.bf16 %v1763_v20, %v1762_v19 }
 0x896   :  { %v1523_v18 = vadd.f32 1.0, %v4204_v10  ;;  %v1764_v10 = vld [vmem:[#allocation5 + $0x618] sm:$0xff] }
 0x897   :  { %4209 = vrcp.f32 %v1524_v25  ;;  %3955 = vmatprep.subr.bf16.mxu0 %v3954_v23  ;;  %v1765_v25 = vld [vmem:[#allocation5 + $0x620] sm:$0xff] }
 0x898   :  { %4211 = vrcp.f32 %v1523_v18  ;;  %3957 = vmatpush3.bf16.msra.mxu0 %v3954_v23  ;;  %v3958_v18 = vpack.c.bf16 %v1765_v25, %v1764_v10  ;;  %v1958_v10 = vld [vmem:[#allocation5 + $0x6c8] sm:$0xff] }
 0x89a   :  { %3959 = vmatprep.subr.bf16.mxu0 %v3958_v18 }
 0x89c   :  { %3961 = vmatpush3.bf16.msra.mxu0 %v3958_v18 }
 0x89d   :  { %v4206_v27 = vpop.eup %4205 }
 0x89e   :  { %1540 = vperm.xlu1 %4192, %v4206_v27   ;;  %v4208_v33 = vpop.eup %4207  ;;  %v1766_v27 = vld [vmem:[#allocation5 + $0x628] sm:$0xff] }
 0x89f   :  { %v3962_v29 = vpack.c.bf16 %v1767_v28, %v1766_v27 }
 0x8a1   :  { %v4210_v35 = vpop.eup %4209  ;;  %3963 = vmatprep.subr.bf16.mxu0 %v3962_v29 }
 0x8a2   :  { %1535 = vperm.xlu1 %4192, %v4208_v33   ;;  %1550 = vperm.xlu0 %4191, %v4210_v35   ;;  %v4212_v39 = vpop.eup %4211  ;;  %v1770_v33 = vld [vmem:[#allocation5 + $0x648] sm:$0xff] }
 0x8a3   :  { %3965 = vmatpush3.bf16.msra.mxu0 %v3962_v29  ;;  %v3966_v35 = vpack.c.bf16 %v1770_v33, %v1769_v31 }
 0x8a5   :  { %3967 = vmatprep.subr.bf16.mxu0 %v3966_v35 }
 0x8a6   :  { %1545 = vperm.xlu1 %4192, %v4212_v39  }
 0x91d   :  { %v1541_v54 = vpop.permute.xlu1 %1540 }
 0x91e   :  { %v1554_v55 = vmul.f32 %v1541_v54, %v4540_v24  ;;  %v3914_v24 = vpack.c.bf16 %v1564_v3, %v1563_v0  ;;  %v3978_v54 = vpack.c.bf16 %v1776_v53, %v1775_v52  ;;  %v2778_v3 = vld [vmem:[#allocation5 + $0x638] ss:$0 sm:$0xff]  ;;  %v2116_v53 = vld [vmem:[#allocation7 + $0x178] sm:$0xff] }
 0x91f   :  { %v2114_v52 = vld [vmem:[#allocation7 + $0x168] sm:$0xff] }
 0x920   :  { %3499 = vmatprep.mubr.f32.mxu1 %v1554_v55  ;;  %v1777_v55 = vld [vmem:[#allocation5 + $0x680] sm:$0xff] }
 0x921   :  { %v1536_v58 = vpop.permute.xlu1 %1535  ;;  %v1551_v59 = vpop.permute.xlu0 %1550  ;;  %v3982_v57 = vpack.c.bf16 %v1778_v56, %v1777_v55  ;;  %v4018_v55 = vpack.c.bf16 %v2116_v53, %v2114_v52  ;;  %v2113_v56 = vld [vmem:[#allocation7 + $0x160] sm:$0xff]  ;;  %v2300_v52 = vld [vmem:[#allocation5 + $0x6f8] sm:$0xff]  ;;  %v2301_v53 = vld [vmem:[#allocation5 + $0x700] sm:$0xff] }
 0x922   :  { %v1553_v34 = vmul.f32 %v1536_v58, %v4536_v22  ;;  %v1556_v60 = vmul.f32 %v1551_v59, %v4544_v26  ;;  %v3918_v22 = vpack.c.bf16 %v1566_v5, %v1565_v4  ;;  %v1568_v26 = vld [vmem:[#allocation5 + $0x508] sm:$0xff]  ;;  %v1779_v58 = vld [vmem:[#allocation5 + $0x690] sm:$0xff]  ;;  %v1780_v59 = vld [vmem:[#allocation5 + $0x698] sm:$0xff] }
 0x923   :  { %v3922_v7 = vpack.c.bf16 %v1568_v26, %v1567_v6 }
 0x924   :  { %3500 = vmatmul.mubr.f32.vlgmr.msra.gmra.mrb[10].mxu1 %v1556_v60  ;;  %v1781_v60 = vld [vmem:[#allocation5 + $0x6a0] sm:$0xff] }
 0x925   :  { %3905 = vmatpush3.bf16.msra.mxu1 %v3902_v38  ;;  %3534 = vmatprep.mubr.f32.mxu1 %v1553_v34  ;;  %v1546_v15 = vpop.permute.xlu1 %1545  ;;  %v3986_v34 = vpack.c.bf16 %v1780_v59, %v1779_v58  ;;  %v2118_v58 = vld [vmem:[#allocation7 + $0x188] sm:$0xff]  ;;  %v2120_v59 = vld [vmem:[#allocation7 + $0x198] sm:$0xff] }
 0x926   :  { %3907 = vmatprep.subr.bf16.mxu1 %v3906_v43  ;;  %v1555_v17 = vmul.f32 %v1546_v15, %v4534_v21  ;;  %v2777_v21 = vld [vmem:[#allocation5 + $0x5b0] ss:$0 sm:$0xff] }
 0x929   :  { %3909 = vmatpush3.bf16.msra.mxu1 %v3906_v43  ;;  %v1782_v43 = vld [vmem:[#allocation5 + $0x6a8] sm:$0xff] }
 0x92a   :  { %3911 = vmatprep.subr.bf16.mxu1 %v3910_v63  ;;  %v3990_v61 = vpack.c.bf16 %v1782_v43, %v1781_v60  ;;  %v4022_v60 = vpack.c.bf16 %v2120_v59, %v2118_v58  ;;  %v2117_v43 = vld [vmem:[#allocation7 + $0x180] sm:$0xff]  ;;  %v2302_v58 = vld [vmem:[#allocation5 + $0x708] sm:$0xff] }
 0x92b   :  { %v2303_v59 = vld [vmem:[#allocation5 + $0x710] sm:$0xff] }
 0x92d   :  { %3913 = vmatpush3.bf16.msra.mxu1 %v3910_v63  ;;  %v1784_v63 = vld [vmem:[#allocation5 + $0x6b8] sm:$0xff] }
 0x92e   :  { %3915 = vmatprep.subr.bf16.mxu1 %v3914_v24  ;;  %v3994_v0 = vpack.c.bf16 %v1784_v63, %v1783_v62  ;;  %v2122_v62 = vld [vmem:[#allocation7 + $0x1a8] sm:$0xff]  ;;  %v2124_v63 = vld [vmem:[#allocation7 + $0x1b8] sm:$0xff] }
 0x931   :  { %3917 = vmatpush3.bf16.msra.mxu1 %v3914_v24 }
 0x932   :  { %3919 = vmatprep.subr.bf16.mxu1 %v3918_v22 }
 0x935   :  { %3921 = vmatpush3.bf16.msra.mxu1 %v3918_v22 }
 0x936   :  { %3923 = vmatprep.subr.bf16.mxu1 %v3922_v7 }
 0x939   :  { %3925 = vmatpush3.bf16.msra.mxu1 %v3922_v7  ;;  %v2779_v7 = vld [vmem:[#allocation5 + $0x6c0] ss:$0 sm:$0xff] }
 0x93a   :  { %3927 = vmatprep.subr.bf16.mxu1 %v3926_v11 }
 0x93d   :  { %3929 = vmatpush3.bf16.msra.mxu1 %v3926_v11 }
 0x93e   :  { %3931 = vmatprep.subr.bf16.mxu1 %v3930_v14 }
 0x941   :  { %3933 = vmatpush3.bf16.msra.mxu1 %v3930_v14 }
 0x944   :  { %3535 = vmatmul.mubr.f32.vlgmr.msra.gmra.mrb[10].mxu1 %v1555_v17 }
 0x945   :  { %3615 = vmatprep.mubr.f32.mxu1 %v1958_v10 }
 0xa17   :  { %v3536_v36 = vpop.f32.mrb[10].mxu1 }
 0xa18   :  { %v1745_v37 = vadd.f32 %v3536_v36, %v2777_v21  ;;  %v1730_v38 = vpop.f32.mrb[11].mxu1  ;;  %v2102_v36 = vld [vmem:[#allocation7 + $0x108] sm:$0xff] }
 0xa19   :  { %v1744_v39 = vadd.f32 %v2777_v21, %v1730_v38  ;;  %v1959_v21 = vld [vmem:[#allocation5 + $0x6d0] sm:$0xff] }
 0xa1a   :  { %vm1747_vm2 = vcmp.ge.f32.partialorder %v1745_v37, 0.0  ;;  %v1749_v40 = vmul.f32 0.01, %v1745_v37  ;;  %v2101_v38 = vld [vmem:[#allocation7 + $0x100] sm:$0xff] }
 0xa1b   :  { %vm1746_vm3 = vcmp.ge.f32.partialorder %v1744_v39, 0.0  ;;  %v1748_v41 = vmul.f32 0.01, %v1744_v39 }
 0xa1c   :  { %v4554_v42 = vsel %vm1747_vm2, %v1745_v37, %v1749_v40  ;;  %v2104_v37 = vld [vmem:[#allocation7 + $0x118] sm:$0xff]  ;;  %v2103_v40 = vld [vmem:[#allocation7 + $0x110] sm:$0xff] }
 0xa1d   :  { %v4556_v44 = vsel %vm1746_vm3, %v1744_v39, %v1748_v41  ;;  %v4006_v39 = vpack.c.bf16 %v2104_v37, %v2102_v36  ;;  %v2106_v41 = vld [vmem:[#allocation7 + $0x128] sm:$0xff] }
 0xa1e   :  { %v1786_v45 = vadd.f32 %v4554_v42, %v4556_v44  ;;  %v1787_v30 = vmax.f32 %v4556_v44, %v4554_v42 }
 0xa20   :  { %v1788_v46 = vmul.f32 0.5, %v1786_v45 }
 0xa22   :  { %3569 = vmatprep.mubr.f32.mxu0 %v1788_v46  ;;  %v2110_v46 = vld [vmem:[#allocation7 + $0x148] sm:$0xff] }
 0xa23   :  { %3570 = vmatmul.mubr.f32.vlgmr.msra.gmra.mrb[24].mxu0 %v1787_v30  ;;  %v2112_v30 = vld [vmem:[#allocation7 + $0x158] sm:$0xff] }
 0xa24   :  { %3969 = vmatpush3.bf16.msra.mxu0 %v3966_v35  ;;  %v4014_v32 = vpack.c.bf16 %v2112_v30, %v2110_v46  ;;  %v2298_v46 = vld [vmem:[#allocation5 + $0x6e8] sm:$0xff]  ;;  %v2299_v30 = vld [vmem:[#allocation5 + $0x6f0] sm:$0xff] }
 0xa25   :  { %3971 = vmatprep.subr.bf16.mxu0 %v3970_v49 }
 0xa28   :  { %3973 = vmatpush3.bf16.msra.mxu0 %v3970_v49  ;;  %v4012_v49 = vpack.c.bf16 %v2107_v48, %v2105_v47 }
 0xa29   :  { %3975 = vmatprep.subr.bf16.mxu0 %v3974_v51 }
 0xa2c   :  { %3977 = vmatpush3.bf16.msra.mxu0 %v3974_v51  ;;  %v2111_v51 = vld [vmem:[#allocation7 + $0x150] sm:$0xff] }
 0xa2d   :  { %3979 = vmatprep.subr.bf16.mxu0 %v3978_v54 }
 0xa30   :  { %3981 = vmatpush3.bf16.msra.mxu0 %v3978_v54  ;;  %v4016_v54 = vpack.c.bf16 %v2111_v51, %v2109_v50  ;;  %v4076_v50 = vpack.c.bf16 %v2299_v30, %v2298_v46  ;;  %v2091_v46 = vld [vmem:[#allocation7 + $0xb0] sm:$0xff]  ;;  %v2094_v30 = vld [vmem:[#allocation7 + $0xc8] sm:$0xff] }
 0xa31   :  { %3983 = vmatprep.subr.bf16.mxu0 %v3982_v57 }
 0xa34   :  { %3985 = vmatpush3.bf16.msra.mxu0 %v3982_v57  ;;  %v2115_v57 = vld [vmem:[#allocation7 + $0x170] sm:$0xff] }
 0xa35   :  { %3987 = vmatprep.subr.bf16.mxu0 %v3986_v34 }
 0xa38   :  { %3989 = vmatpush3.bf16.msra.mxu0 %v3986_v34  ;;  %v4020_v34 = vpack.c.bf16 %v2115_v57, %v2113_v56  ;;  %v4080_v56 = vpack.c.bf16 %v2301_v53, %v2300_v52  ;;  %v2095_v52 = vld [vmem:[#allocation7 + $0xd0] sm:$0xff]  ;;  %v2098_v53 = vld [vmem:[#allocation7 + $0xe8] sm:$0xff] }
 0xa39   :  { %3991 = vmatprep.subr.bf16.mxu0 %v3990_v61 }
 0xa3c   :  { %3993 = vmatpush3.bf16.msra.mxu0 %v3990_v61  ;;  %v2119_v61 = vld [vmem:[#allocation7 + $0x190] sm:$0xff] }
 0xa3d   :  { %3995 = vmatprep.subr.bf16.mxu0 %v3994_v0 }
 0xa40   :  { %3997 = vmatpush3.bf16.msra.mxu0 %v3994_v0  ;;  %v4024_v0 = vpack.c.bf16 %v2119_v61, %v2117_v43  ;;  %v4084_v43 = vpack.c.bf16 %v2303_v59, %v2302_v58  ;;  %v2099_v58 = vld [vmem:[#allocation7 + $0xf0] sm:$0xff] }
 0xaf6   :  { %v3571_v24 = vpop.f32.mrb[24].mxu0 }
 0xaf7   :  { %v1865_v4 = vadd.f32 %v3571_v24, %v2778_v3  ;;  %v1859_v5 = vpop.f32.mrb[25].mxu0  ;;  %v2121_v24 = vld [vmem:[#allocation7 + $0x1a0] sm:$0xff] }
 0xaf8   :  { %v1860_v22 = vadd.f32 %v2778_v3, %v1859_v5  ;;  %v4026_v3 = vpack.c.bf16 %v2124_v63, %v2122_v62  ;;  %v2126_v5 = vld [vmem:[#allocation7 + $0x1c8] sm:$0xff]  ;;  %v2305_v63 = vld [vmem:[#allocation5 + $0x720] sm:$0xff] }
 0xaf9   :  { %v1869_v26 = vmax.f32 %v1865_v4, 0.0  ;;  %v2123_v4 = vld [vmem:[#allocation7 + $0x1b0] sm:$0xff]  ;;  %v2304_v62 = vld [vmem:[#allocation5 + $0x718] sm:$0xff] }
 0xafa   :  { %v1868_v6 = vmax.f32 %v1860_v22, 0.0  ;;  %v2128_v22 = vld [vmem:[#allocation7 + $0x1d8] sm:$0xff] }
 0xafc   :  { %3604 = vmatprep.mubr.f32.mxu0 %v1868_v6  ;;  %v4028_v6 = vpack.c.bf16 %v2123_v4, %v2121_v24  ;;  %v4088_v24 = vpack.c.bf16 %v2305_v63, %v2304_v62  ;;  %v2308_v63 = vld [vmem:[#allocation5 + $0x738] sm:$0xff] }
 0xafd   :  { %3605 = vmatmul.mubr.f32.vlgmr.msra.gmra.mrb[26].mxu0 %v1869_v26  ;;  %v4030_v26 = vpack.c.bf16 %v2128_v22, %v2126_v5  ;;  %v2306_v5 = vld [vmem:[#allocation5 + $0x728] sm:$0xff]  ;;  %v2307_v22 = vld [vmem:[#allocation5 + $0x730] sm:$0xff] }
 0xbd0   :  { %v3606_v8 = vpop.f32.mrb[26].mxu0 }
 0xbd1   :  { %v1946_v9 = vadd.f32 %v3606_v8, %v2779_v7  ;;  %v1940_v11 = vpop.f32.mrb[27].mxu0  ;;  %v2127_v8 = vld [vmem:[#allocation7 + $0x1d0] sm:$0xff] }
 0xbd2   :  { %v1941_v12 = vadd.f32 %v2779_v7, %v1940_v11  ;;  %v2125_v7 = vld [vmem:[#allocation7 + $0x1c0] sm:$0xff]  ;;  %v2132_v11 = vld [vmem:[#allocation7 + $0x1f8] sm:$0xff] }
 0xbd4   :  { %v1949_v13 = vadd.f32 %v1946_v9, %v1941_v12  ;;  %v2130_v9 = vld [vmem:[#allocation7 + $0x1e8] sm:$0xff]  ;;  %v4032_v12 = vpack.c.bf16 %v2127_v8, %v2125_v7  ;;  %v2071_v7 = vld [vmem:[#allocation7 + $0x10] sm:$0xff] }
 0xbd5   :  { %v2074_v8 = vld [vmem:[#allocation7 + $0x28] sm:$0xff] }
 0xbd6   :  { %v2780_v14 = vmul.f32 -1.442695, %v1949_v13  ;;  %v4034_v13 = vpack.c.bf16 %v2132_v11, %v2130_v9  ;;  %v2076_v9 = vld [vmem:[#allocation7 + $0x38] sm:$0xff] }
 0xbd8   :  { %4213 = vpow2.f32 %v2780_v14  ;;  %v2129_v14 = vld [vmem:[#allocation7 + $0x1e0] sm:$0xff] }
 0xbe2   :  { %v4214_v15 = vpop.eup %4213 }
 0xbe3   :  { %v1953_v17 = vadd.f32 1.0, %v4214_v15  ;;  %v2131_v15 = vld [vmem:[#allocation7 + $0x1f0] sm:$0xff] }
 0xbe5   :  { %4215 = vrcp.f32 %v1953_v17  ;;  %v4036_v17 = vpack.c.bf16 %v2131_v15, %v2129_v14  ;;  %v4042_v14 = vpack.c.bf16 %v2076_v9, %v2074_v8  ;;  %v2073_v15 = vld [vmem:[#allocation7 + $0x20] sm:$0xff]  ;;  %v2280_v8 = vsub.s32 0, %v4427_v16 }
 0xbe6   :  { %v2276_v9 = vld [vmem:[#allocation7 + $0x200] ss:$8 sm:$0x3] }
 0xbef   :  { %v4216_v19 = vpop.eup %4215 }
 0xbf0   :  { %v4563_v20 = vmul.f32 %v4216_v19, %v4554_v42  ;;  %v4566_v23 = vmul.f32 %v4216_v19, %v4556_v44  ;;  %v2108_v42 = vld [vmem:[#allocation7 + $0x138] sm:$0xff]  ;;  %v4008_v44 = vpack.c.bf16 %v2103_v40, %v2101_v38  ;;  %v2312_v38 = vld [vmem:[#allocation5 + $0x758] sm:$0xff] }
 0xbf1   :  { %v4010_v45 = vpack.c.bf16 %v2108_v42, %v2106_v41  ;;  %v2296_v40 = vld [vmem:[#allocation5 + $0x6d8] sm:$0xff]  ;;  %v2297_v42 = vld [vmem:[#allocation5 + $0x6e0] sm:$0xff] }
 0xbf2   :  { %1962 = vmax.xlane.f32.xlu0 %v4563_v20  ;;  %1960 = vmax.xlane.f32.xlu1 %v4566_v23  ;;  %v4072_v47 = vpack.c.bf16 %v2297_v42, %v2296_v40  ;;  %v2085_v40 = vld [vmem:[#allocation7 + $0x80] sm:$0xff]  ;;  %v2090_v42 = vld [vmem:[#allocation7 + $0xa8] sm:$0xff] }
 0xbf6   :  { %1966 = vadd.xlane.f32.xlu0 %v4563_v20  ;;  %1964 = vadd.xlane.f32.xlu1 %v4566_v23 }
 0xc7f   :  { %v1963_v25 = vpop.xlane.xlu0 %1962  ;;  %v1961_v18 = vpop.xlane.xlu1 %1960 }
 0xc80   :  { %v3998_v27 = vpack.c.bf16 %v1963_v25, %v1961_v18 }
 0xc82   :  { %3999 = vmatprep.subr.bf16.mxu1 %v3998_v27 }
 0xc83   :  { %v1967_v28 = vpop.xlane.xlu0 %1966  ;;  %4001 = vmatpush3.bf16.msra.mxu1 %v3998_v27  ;;  %v1965_v29 = vpop.xlane.xlu1 %1964 }
 0xc84   :  { %v1969_v31 = vmul.f32 0.0078125, %v1967_v28  ;;  %v1968_v33 = vmul.f32 0.0078125, %v1965_v29 }
 0xc86   :  { %v4002_v35 = vpack.c.bf16 %v1969_v31, %v1968_v33  ;;  %v2070_v33 = vld [vmem:[#allocation7 + $0x8] sm:$0xff] }
 0xc88   :  { %4003 = vmatprep.subr.bf16.mxu1 %v4002_v35 }
 0xc89   :  { %4005 = vmatpush3.bf16.msra.mxu1 %v4002_v35  ;;  %v2072_v35 = vld [vmem:[#allocation7 + $0x18] sm:$0xff] }
 0xc8a   :  { %4007 = vmatprep.subr.bf16.mxu1 %v4006_v39  ;;  %v4038_v36 = vpack.c.bf16 %v2072_v35, %v2070_v33  ;;  %v2313_v39 = vld [vmem:[#allocation5 + $0x760] sm:$0xff]  ;;  %v2081_v35 = vld [vmem:[#allocation7 + $0x60] sm:$0xff] }
 0xc8b   :  { %v4070_v41 = vpack.c.bf16 %v2313_v39, %v2312_v38 }
 0xc8c   :  { %3616 = vmatmul.mubr.f32.vlgmr.msra.gmra.mrb[12].mxu1 %v1959_v21 }
 0xc8d   :  { %2197 = vmatprep.mubr.f32.mxu1 %v4317_v2  ;;  %4009 = vmatpush1.bf16.msra.mxu1 %v4008_v44  ;;  %v2314_v44 = vld [vmem:[#allocation5 + $0x768] sm:$0xff] }
 0xc8e   :  { %4011 = vmatprep.subr.bf16.mxu1 %v4010_v45  ;;  %v2315_v45 = vld [vmem:[#allocation5 + $0x770] sm:$0xff]  ;;  %4071 = vmatprep.subr.bf16.mxu0 %v4070_v41  ;;  %v2087_v41 = vld [vmem:[#allocation7 + $0x90] sm:$0xff] }
 0xc8f   :  { %v4074_v48 = vpack.c.bf16 %v2315_v45, %v2314_v44  ;;  %4073 = vmatpush3.bf16.msra.mxu0 %v4072_v47  ;;  %v2092_v44 = vld [vmem:[#allocation7 + $0xb8] sm:$0xff]  ;;  %v4056_v45 = vpack.c.bf16 %v2087_v41, %v2085_v40  ;;  %v2337_v41 = vld [vmem:[#allocation7 + $0x250] sm:$0xff] }
 0xc90   :  { %v4058_v47 = vpack.c.bf16 %v2092_v44, %v2090_v42  ;;  %v2339_v42 = vld [vmem:[#allocation7 + $0x260] sm:$0xff]  ;;  %v2342_v44 = vld [vmem:[#allocation7 + $0x278] sm:$0xff] }
 0xc91   :  { %4013 = vmatpush1.bf16.msra.mxu1 %v4012_v49  ;;  %v2316_v49 = vld [vmem:[#allocation5 + $0x778] sm:$0xff]  ;;  %4075 = vmatprep.subr.bf16.mxu0 %v4074_v48  ;;  %v2089_v48 = vld [vmem:[#allocation7 + $0xa0] sm:$0xff] }
 0xc92   :  { %4015 = vmatprep.subr.bf16.mxu1 %v4014_v32  ;;  %v2317_v32 = vld [vmem:[#allocation5 + $0x780] sm:$0xff] }
 0xc93   :  { %v4078_v51 = vpack.c.bf16 %v2317_v32, %v2316_v49  ;;  %4077 = vmatpush3.bf16.msra.mxu0 %v4076_v50  ;;  %v2096_v49 = vld [vmem:[#allocation7 + $0xd8] sm:$0xff]  ;;  %v4060_v32 = vpack.c.bf16 %v2091_v46, %v2089_v48  ;;  %v2341_v46 = vld [vmem:[#allocation7 + $0x270] sm:$0xff] }
 0xc94   :  { %v4062_v50 = vpack.c.bf16 %v2096_v49, %v2094_v30  ;;  %v2343_v30 = vld [vmem:[#allocation7 + $0x280] sm:$0xff]  ;;  %v2346_v49 = vld [vmem:[#allocation7 + $0x298] sm:$0xff] }
 0xc95   :  { %4017 = vmatpush1.bf16.msra.mxu1 %v4016_v54  ;;  %v2318_v54 = vld [vmem:[#allocation5 + $0x788] sm:$0xff]  ;;  %4079 = vmatprep.subr.bf16.mxu0 %v4078_v51  ;;  %v2093_v51 = vld [vmem:[#allocation7 + $0xc0] sm:$0xff] }
 0xc96   :  { %4019 = vmatprep.subr.bf16.mxu1 %v4018_v55  ;;  %v2319_v55 = vld [vmem:[#allocation5 + $0x790] sm:$0xff] }
 0xc97   :  { %v4082_v57 = vpack.c.bf16 %v2319_v55, %v2318_v54  ;;  %4081 = vmatpush3.bf16.msra.mxu0 %v4080_v56  ;;  %v2100_v54 = vld [vmem:[#allocation7 + $0xf8] sm:$0xff]  ;;  %v4064_v55 = vpack.c.bf16 %v2095_v52, %v2093_v51  ;;  %v2345_v52 = vld [vmem:[#allocation7 + $0x290] sm:$0xff] }
 0xc98   :  { %v4066_v56 = vpack.c.bf16 %v2100_v54, %v2098_v53  ;;  %v2347_v53 = vld [vmem:[#allocation7 + $0x2a0] sm:$0xff]  ;;  %v2350_v54 = vld [vmem:[#allocation7 + $0x2b8] sm:$0xff] }
 0xc99   :  { %4021 = vmatpush1.bf16.msra.mxu1 %v4020_v34  ;;  %v2320_v34 = vld [vmem:[#allocation5 + $0x798] sm:$0xff]  ;;  %4083 = vmatprep.subr.bf16.mxu0 %v4082_v57  ;;  %v2097_v57 = vld [vmem:[#allocation7 + $0xe0] sm:$0xff] }
 0xc9a   :  { %4023 = vmatprep.subr.bf16.mxu1 %v4022_v60  ;;  %v2321_v60 = vld [vmem:[#allocation5 + $0x7a0] sm:$0xff]  ;;  %v4068_v59 = vpack.c.bf16 %v2099_v58, %v2097_v57 }
 0xc9b   :  { %v4086_v61 = vpack.c.bf16 %v2321_v60, %v2320_v34  ;;  %4085 = vmatpush3.bf16.msra.mxu0 %v4084_v43  ;;  %v2324_v43 = vld [vmem:[#allocation5 + $0x7b8] sm:$0xff]  ;;  %v2349_v58 = vld [vmem:[#allocation7 + $0x2b0] sm:$0xff] }
 0xc9d   :  { %4025 = vmatpush1.bf16.msra.mxu1 %v4024_v0  ;;  %v2322_v0 = vld [vmem:[#allocation5 + $0x7a8] sm:$0xff]  ;;  %4087 = vmatprep.subr.bf16.mxu0 %v4086_v61  ;;  %v2325_v61 = vld [vmem:[#allocation5 + $0x7c0] sm:$0xff] }
 0xc9e   :  { %4027 = vmatprep.subr.bf16.mxu1 %v4026_v3  ;;  %v2323_v3 = vld [vmem:[#allocation5 + $0x7b0] sm:$0xff]  ;;  %v4094_v62 = vpack.c.bf16 %v2325_v61, %v2324_v43  ;;  %v2356_v43 = vld [vmem:[#allocation7 + $0x2e8] sm:$0xff] }
 0xc9f   :  { %v4090_v4 = vpack.c.bf16 %v2323_v3, %v2322_v0  ;;  %4089 = vmatpush3.bf16.msra.mxu0 %v4088_v24  ;;  %v2309_v0 = vld [vmem:[#allocation5 + $0x740] sm:$0xff]  ;;  %v2326_v24 = vld [vmem:[#allocation5 + $0x7c8] sm:$0xff] }
 0xca0   :  { %v4096_v3 = vpack.c.bf16 %v2309_v0, %v2308_v63  ;;  %v2355_v63 = vld [vmem:[#allocation7 + $0x2e0] sm:$0xff] }
 0xca1   :  { %4029 = vmatpush1.bf16.msra.mxu1 %v4028_v6  ;;  %v4092_v6 = vpack.c.bf16 %v2307_v22, %v2306_v5  ;;  %4091 = vmatprep.subr.bf16.mxu0 %v4090_v4  ;;  %v2327_v4 = vld [vmem:[#allocation5 + $0x7d0] sm:$0xff]  ;;  %v2310_v22 = vld [vmem:[#allocation5 + $0x748] sm:$0xff] }
 0xca2   :  { %4031 = vmatprep.subr.bf16.mxu1 %v4030_v26  ;;  %v2069_v26 = vld [vmem:[#allocation7] sm:$0xff]  ;;  %v4098_v5 = vpack.c.bf16 %v2327_v4, %v2326_v24  ;;  %v2360_v24 = vld [vmem:[#allocation7 + $0x308] sm:$0xff] }
 0xca3   :  { %4093 = vmatpush3.bf16.msra.mxu0 %v4092_v6  ;;  %v2311_v6 = vld [vmem:[#allocation5 + $0x750] sm:$0xff] }
 0xca4   :  { %4095 = vmatprep.subr.bf16.mxu0 %v4094_v62  ;;  %v2353_v62 = vld [vmem:[#allocation7 + $0x2d0] sm:$0xff] }
 0xca5   :  { %4033 = vmatpush1.bf16.msra.mxu1 %v4032_v12  ;;  %v4040_v12 = vpack.c.bf16 %v2071_v7, %v2069_v26  ;;  %v2332_v26 = vld [vmem:[#allocation7 + $0x228] sm:$0xff]  ;;  %v4128_v0 = vpack.c.bf16 %v2355_v63, %v2353_v62  ;;  %v2662_v62 = vld [vmem:[#allocation5 + $0x8a0] sm:$0xff] }
 0xca6   :  { %4035 = vmatprep.subr.bf16.mxu1 %v4034_v13 }
 0xca7   :  { %4097 = vmatpush3.bf16.msra.mxu0 %v4096_v3  ;;  %v2358_v3 = vld [vmem:[#allocation7 + $0x2f8] sm:$0xff] }
 0xca8   :  { %4099 = vmatprep.subr.bf16.mxu0 %v4098_v5  ;;  %v4130_v4 = vpack.c.bf16 %v2360_v24, %v2358_v3  ;;  %v2357_v5 = vld [vmem:[#allocation7 + $0x2f0] sm:$0xff]  ;;  %v2645_v3 = vld [vmem:[#allocation5 + $0x818] sm:$0xff] }
 0xca9   :  { %4037 = vmatpush1.bf16.msra.mxu1 %v4036_v17  ;;  %v2075_v17 = vld [vmem:[#allocation7 + $0x30] sm:$0xff] }
 0xcaa   :  { %4039 = vmatprep.subr.bf16.mxu1 %v4038_v36  ;;  %v2086_v36 = vld [vmem:[#allocation7 + $0x88] sm:$0xff]  ;;  %v2646_v24 = vld [vmem:[#allocation5 + $0x820] sm:$0xff] }
 0xd5f   :  { %v3617_v19 = vpop.f32.mrb[12].mxu1 }
 0xd60   :  { %v2782_v10 = vmul.f32 -1.442695, %v3617_v19  ;;  %v2036_v25 = vpop.f32.mrb[13].mxu1  ;;  %v2078_v19 = vld [vmem:[#allocation7 + $0x48] sm:$0xff] }
 0xd61   :  { %v2781_v18 = vmul.f32 -1.442695, %v2036_v25  ;;  %v4044_v25 = vpack.c.bf16 %v2075_v17, %v2073_v15 }
 0xd62   :  { %4217 = vpow2.f32 %v2782_v10  ;;  %v2080_v10 = vld [vmem:[#allocation7 + $0x58] sm:$0xff] }
 0xd63   :  { %4219 = vpow2.f32 %v2781_v18  ;;  %v4046_v18 = vpack.c.bf16 %v2080_v10, %v2078_v19  ;;  %v2329_v10 = vld [vmem:[#allocation7 + $0x210] sm:$0xff] }
 0xd6c   :  { %v4218_v27 = vpop.eup %4217 }
 0xd6d   :  { %v4220_v28 = vpop.eup %4219  ;;  %v2052_v29 = vadd.f32 1.0, %v4218_v27  ;;  %v2077_v27 = vld [vmem:[#allocation7 + $0x40] sm:$0xff] }
 0xd6e   :  { %v2051_v31 = vadd.f32 1.0, %v4220_v28  ;;  %v2079_v28 = vld [vmem:[#allocation7 + $0x50] sm:$0xff] }
 0xd6f   :  { %4221 = vrcp.f32 %v2052_v29  ;;  %v2082_v29 = vld [vmem:[#allocation7 + $0x68] sm:$0xff]  ;;  %v4048_v33 = vpack.c.bf16 %v2079_v28, %v2077_v27  ;;  %v2334_v27 = vld [vmem:[#allocation7 + $0x238] sm:$0xff] }
 0xd70   :  { %4223 = vrcp.f32 %v2051_v31  ;;  %v2084_v31 = vld [vmem:[#allocation7 + $0x78] sm:$0xff]  ;;  %v2336_v28 = vld [vmem:[#allocation7 + $0x248] sm:$0xff] }
 0xd79   :  { %v4222_v21 = vpop.eup %4221 }
 0xd7a   :  { %v4224_v37 = vpop.eup %4223  ;;  %2064 = vperm.xlu1 %4192, %v4222_v21   ;;  %v2083_v21 = vld [vmem:[#allocation7 + $0x70] sm:$0xff] }
 0xd7b   :  { %2059 = vperm.xlu0 %4191, %v4224_v37   ;;  %v2088_v37 = vld [vmem:[#allocation7 + $0x98] sm:$0xff]  ;;  %v4052_v38 = vpack.c.bf16 %v2083_v21, %v2081_v35  ;;  %v2333_v35 = vld [vmem:[#allocation7 + $0x230] sm:$0xff]  ;;  %v2335_v21 = vld [vmem:[#allocation7 + $0x240] sm:$0xff] }
 0xd7c   :  { %v4054_v39 = vpack.c.bf16 %v2088_v37, %v2086_v36  ;;  %v2338_v37 = vld [vmem:[#allocation7 + $0x258] sm:$0xff] }
 0xdf9   :  { %v2065_v11 = vpop.permute.xlu1 %2064 }
 0xdfa   :  { %v2068_v13 = vmul.f32 %v2065_v11, %v4563_v20  ;;  %v4050_v20 = vpack.c.bf16 %v2084_v31, %v2082_v29  ;;  %v2060_v34 = vpop.permute.xlu0 %2059  ;;  %v2284_v11 = vsub.s32 1, %v4427_v16 }
 0xdfb   :  { %v2067_v60 = vmul.f32 %v2060_v34, %v4566_v23  ;;  %v4100_v23 = vpack.c.bf16 %v2311_v6, %v2310_v22  ;;  %v2359_v22 = vld [vmem:[#allocation7 + $0x300] sm:$0xff] }
 0xdfc   :  { %2198 = vmatmul.mubr.f32.vlgmr.msra.gmra.mrb[14].mxu1 %v2068_v13  ;;  %v2285_v13 = vrot.slane %v2276_v9, %v2284_v11  ;;  %v4132_v6 = vpack.c.bf16 %v2359_v22, %v2357_v5  ;;  %v2664_v5 = vld [vmem:[#allocation5 + $0x8b0] sm:$0xff]  ;;  %v4151_v22 = vpack.c.bf16 %v2646_v24, %v2645_v3 }
 0xdfd   :  { %4041 = vmatpush1.bf16.msra.mxu1 %v4040_v12  ;;  %2268 = vmatprep.mubr.f32.mxu1 %v4317_v2  ;;  %v2281_v12 = vrot.slane %v2276_v9, %v2280_v8 }
 0xdfe   :  { %4043 = vmatprep.subr.bf16.mxu1 %v4042_v14  ;;  %4101 = vmatpush3.bf16.msra.mxu0 %v4100_v23 }
 0xe01   :  { %4045 = vmatpush1.bf16.msra.mxu1 %v4044_v25  ;;  %v2331_v25 = vld [vmem:[#allocation7 + $0x220] sm:$0xff] }
 0xe02   :  { %4047 = vmatprep.subr.bf16.mxu1 %v4046_v18  ;;  %v4104_v31 = vpack.c.bf16 %v2331_v25, %v2329_v10  ;;  %v2362_v10 = vld [vmem:[#allocation7 + $0x310] ss:$8 sm:$0x3] }
 0xe03   :  { %v2448_v25 = vrot.slane %v2362_v10, %v2280_v8 }
 0xe05   :  { %4049 = vmatpush1.bf16.msra.mxu1 %v4048_v33 }
 0xe06   :  { %4051 = vmatprep.subr.bf16.mxu1 %v4050_v20  ;;  %v4106_v20 = vpack.c.bf16 %v2336_v28, %v2334_v27  ;;  %v4169_v27 = vadd.f32 %v2448_v25, %v2448_v25  ;;  %v2651_v25 = vld [vmem:[#allocation5 + $0x848] sm:$0xff] }
 0xe09   :  { %4053 = vmatpush1.bf16.msra.mxu1 %v4052_v38  ;;  %v2340_v38 = vld [vmem:[#allocation7 + $0x268] sm:$0xff] }
 0xe0a   :  { %4055 = vmatprep.subr.bf16.mxu1 %v4054_v39  ;;  %v4108_v39 = vpack.c.bf16 %v2335_v21, %v2333_v35  ;;  %v4110_v40 = vpack.c.bf16 %v2340_v38, %v2338_v37 }
 0xe0d   :  { %4057 = vmatpush1.bf16.msra.mxu1 %v4056_v45  ;;  %v2344_v45 = vld [vmem:[#allocation7 + $0x288] sm:$0xff] }
 0xe0e   :  { %4059 = vmatprep.subr.bf16.mxu1 %v4058_v47  ;;  %v4112_v47 = vpack.c.bf16 %v2339_v42, %v2337_v41  ;;  %v4114_v48 = vpack.c.bf16 %v2344_v45, %v2342_v44 }
 0xe11   :  { %4061 = vmatpush1.bf16.msra.mxu1 %v4060_v32  ;;  %v2348_v32 = vld [vmem:[#allocation7 + $0x2a8] sm:$0xff] }
 0xe12   :  { %4063 = vmatprep.subr.bf16.mxu1 %v4062_v50  ;;  %v4116_v50 = vpack.c.bf16 %v2343_v30, %v2341_v46  ;;  %v4118_v51 = vpack.c.bf16 %v2348_v32, %v2346_v49  ;;  %v2548_v30 = vld [vmem:[#allocation5 + $0x7e0] sm:$0xff]  ;;  %v2656_v49 = vld [vmem:[#allocation5 + $0x870] sm:$0xff]  ;;  %v2639_v32 = vld [vmem:[#allocation5 + $0x7e8] sm:$0xff] }
 0xe15   :  { %4065 = vmatpush1.bf16.msra.mxu1 %v4064_v55  ;;  %v2352_v55 = vld [vmem:[#allocation7 + $0x2c8] sm:$0xff] }
 0xe16   :  { %4067 = vmatprep.subr.bf16.mxu1 %v4066_v56  ;;  %v4120_v56 = vpack.c.bf16 %v2347_v53, %v2345_v52  ;;  %v4122_v57 = vpack.c.bf16 %v2352_v55, %v2350_v54  ;;  %v2658_v52 = vld [vmem:[#allocation5 + $0x880] sm:$0xff]  ;;  %v2641_v55 = vld [vmem:[#allocation5 + $0x7f8] sm:$0xff] }
 0xe19   :  { %4069 = vmatpush1.bf16.msra.mxu1 %v4068_v59  ;;  %v2351_v59 = vld [vmem:[#allocation7 + $0x2c0] sm:$0xff] }
 0xe1a   :  { %4134 = vmatprep.subr.bf16.mxu1 %v4315_v1  ;;  %v2330_v1 = vld [vmem:[#allocation7 + $0x218] sm:$0xff]  ;;  %v4124_v34 = vpack.c.bf16 %v2351_v59, %v2349_v58  ;;  %v2660_v58 = vld [vmem:[#allocation5 + $0x890] sm:$0xff] }
 0xe1b   :  { %v4102_v7 = vpack.c.bf16 %v2332_v26, %v2330_v1  ;;  %v2783_v1 = vld [vmem:[#allocation5 + $0x7d8] ss:$0 sm:$0xff] }
 0xe1c   :  { %2269 = vmatmul.mubr.f32.vlgmr.msra.gmra.mrb[14].mxu1 %v2067_v60  ;;  %v2354_v60 = vld [vmem:[#allocation7 + $0x2d8] sm:$0xff] }
 0xe1d   :  { %3622 = vmatprep.mubr.msk.f32.mxu1 %vm4316_vm0, %v4317_v2  ;;  %4103 = vmatprep.subr.bf16.mxu0 %v4102_v7  ;;  %v4126_v61 = vpack.c.bf16 %v2356_v43, %v2354_v60  ;;  %v2643_v60 = vld [vmem:[#allocation5 + $0x808] sm:$0xff]  ;;  %v2644_v43 = vld [vmem:[#allocation5 + $0x810] sm:$0xff] }
 0xe1e   :  { %v4147_v63 = vpack.c.bf16 %v2644_v43, %v2643_v60 }
 0xeef   :  { %v2270_v14 = vpop.f32.mrb[14].mxu1 }
 0xef0   :  { %v2288_v15 = vadd.f32 %v2281_v12, %v2270_v14  ;;  %v2272_v17 = vpop.f32.mrb[15].mxu1 }
 0xef1   :  { %v2289_v19 = vadd.f32 %v2285_v13, %v2272_v17 }
 0xef2   :  { %v2292_v18 = vmul.f32 0.01, %v2288_v15  ;;  %vm2290_vm0 = vcmp.ge.f32.partialorder %v2288_v15, 0.0 }
 0xef3   :  { %v2293_v29 = vmul.f32 0.01, %v2289_v19  ;;  %vm2291_vm4 = vcmp.ge.f32.partialorder %v2289_v19, 0.0 }
 0xef4   :  { %v4588_v36 = vsel %vm2290_vm0, %v2288_v15, %v2292_v18  ;;  %v2452_v18 = vrot.slane %v2362_v10, %v2284_v11 }
 0xef5   :  { %v4585_v33 = vsel %vm2291_vm4, %v2289_v19, %v2293_v29 }
 0xef6   :  { %2431 = vmatprep.mubr.f32.mxu0 %v4585_v33  ;;  %v4171_v28 = vadd.f32 %v2452_v18, %v2452_v18  ;;  %v2652_v18 = vld [vmem:[#allocation5 + $0x850] sm:$0xff] }
 0xef7   :  { %2432 = vmatmul.mubr.f32.vlgmr.msra.gmra.mrb[28].mxu0 %v4588_v36 }
 0xef8   :  { %2436 = vmatprep.mubr.f32.mxu0 %v4585_v33  ;;  %4105 = vmatpush1.bf16.msra.mxu0 %v4104_v31 }
 0xef9   :  { %4107 = vmatprep.subr.bf16.mxu0 %v4106_v20 }
 0xefb   :  { %2437 = vmatmul.mubr.f32.gmra.mrb[30].mxu0 %v4588_v36 }
 0xefc   :  { %4109 = vmatpush1.bf16.msra.mxu0 %v4108_v39  ;;  %2519 = vmatprep.mubr.f32.mxu0 %v4317_v2 }
 0xefd   :  { %4111 = vmatprep.subr.bf16.mxu0 %v4110_v40 }
 0xf00   :  { %4113 = vmatpush1.bf16.msra.mxu0 %v4112_v47 }
 0xf01   :  { %4115 = vmatprep.subr.bf16.mxu0 %v4114_v48 }
 0xf04   :  { %4117 = vmatpush1.bf16.msra.mxu0 %v4116_v50  ;;  %v2640_v50 = vld [vmem:[#allocation5 + $0x7f0] sm:$0xff] }
 0xf05   :  { %4119 = vmatprep.subr.bf16.mxu0 %v4118_v51  ;;  %v2657_v51 = vld [vmem:[#allocation5 + $0x878] sm:$0xff]  ;;  %v4139_v53 = vpack.c.bf16 %v2640_v50, %v2639_v32 }
 0xf06   :  { %v4141_v54 = vpack.c.bf16 %v2658_v52, %v2657_v51 }
 0xf08   :  { %4121 = vmatpush1.bf16.msra.mxu0 %v4120_v56  ;;  %v2642_v56 = vld [vmem:[#allocation5 + $0x800] sm:$0xff] }
 0xf09   :  { %4123 = vmatprep.subr.bf16.mxu0 %v4122_v57  ;;  %v2659_v57 = vld [vmem:[#allocation5 + $0x888] sm:$0xff]  ;;  %v4143_v59 = vpack.c.bf16 %v2642_v56, %v2641_v55 }
 0xf0c   :  { %4125 = vmatpush1.bf16.msra.mxu0 %v4124_v34  ;;  %v4145_v34 = vpack.c.bf16 %v2660_v58, %v2659_v57 }
 0xf0d   :  { %4127 = vmatprep.subr.bf16.mxu0 %v4126_v61  ;;  %v2661_v61 = vld [vmem:[#allocation5 + $0x898] sm:$0xff] }
 0xf10   :  { %4129 = vmatpush1.bf16.msra.mxu0 %v4128_v0  ;;  %v4149_v0 = vpack.c.bf16 %v2662_v62, %v2661_v61 }
 0xf11   :  { %4131 = vmatprep.subr.bf16.mxu0 %v4130_v4  ;;  %v2663_v4 = vld [vmem:[#allocation5 + $0x8a8] sm:$0xff] }
 0xf14   :  { %4133 = vmatpush1.bf16.msra.mxu0 %v4132_v6  ;;  %v4153_v6 = vpack.c.bf16 %v2664_v5, %v2663_v4 }
 0xfca   :  { %v3070_v23 = vpop.f32.mrb[28].mxu0 }
 0xfcb   :  { %v3071_v26 = vpop.f32.mrb[29].mxu0 }
 0xfcc   :  { %v3072_v7 = vadd.f32 %v3071_v26, %v3070_v23  ;;  %v2647_v23 = vld [vmem:[#allocation5 + $0x828] sm:$0xff]  ;;  %v2665_v26 = vld [vmem:[#allocation5 + $0x8b8] sm:$0xff] }
 0xfce   :  { %v2434_v9 = vadd.f32 %v3072_v7, %v2783_v1  ;;  %v3073_v12 = vpop.f32.mrb[30].mxu0  ;;  %v2666_v7 = vld [vmem:[#allocation5 + $0x8c0] sm:$0xff] }
 0xfcf   :  { %v3074_v13 = vpop.f32.mrb[31].mxu0 }
 0xfd0   :  { %v2442_v14 = vmax.f32 %v2434_v9, 0.0  ;;  %v3075_v15 = vadd.f32 %v3074_v13, %v3073_v12  ;;  %v4157_v12 = vpack.c.bf16 %v2666_v7, %v2665_v26  ;;  %v2649_v13 = vld [vmem:[#allocation5 + $0x838] sm:$0xff] }
 0xfd2   :  { %2520 = vmatmul.mubr.f32.vlgmr.msra.gmra.mrb[32].mxu0 %v2442_v14  ;;  %v2439_v17 = vadd.f32 %v3075_v15, %v2783_v1  ;;  %v2648_v1 = vld [vmem:[#allocation5 + $0x830] sm:$0xff]  ;;  %v2650_v14 = vld [vmem:[#allocation5 + $0x840] sm:$0xff]  ;;  %v2667_v15 = vld [vmem:[#allocation5 + $0x8c8] sm:$0xff] }
 0xfd3   :  { %2525 = vmatprep.mubr.f32.mxu0 %v4317_v2  ;;  %v4155_v9 = vpack.c.bf16 %v2648_v1, %v2647_v23 }
 0xfd4   :  { %v2443_v19 = vmax.f32 %v2439_v17, 0.0  ;;  %v2668_v17 = vld [vmem:[#allocation5 + $0x8d0] sm:$0xff] }
 0xfd5   :  { %v4161_v10 = vpack.c.bf16 %v2668_v17, %v2667_v15 }
 0xfda   :  { %2526 = vmatmul.mubr.f32.gmra.mrb[32].mxu0 %v2443_v19  ;;  %v4159_v19 = vpack.c.bf16 %v2650_v14, %v2649_v13 }
0x10ad   :  { %v2527_v29 = vpop.f32.mrb[32].mxu0 }
0x10ae   :  { %v4170_v31 = vadd.f32 %v4169_v27, %v2527_v29  ;;  %v2529_v20 = vpop.f32.mrb[33].mxu0  ;;  %v2669_v27 = vld [vmem:[#allocation5 + $0x8d8] sm:$0xff]  ;;  %v4163_v29 = vpack.c.bf16 %v2652_v18, %v2651_v25 }
0x10af   :  { %v4172_v35 = vadd.f32 %v4171_v28, %v2529_v20  ;;  %v2670_v28 = vld [vmem:[#allocation5 + $0x8e0] sm:$0xff] }
0x10b0   :  { %v2784_v21 = vmul.f32 -1.442695, %v4170_v31  ;;  %v4165_v31 = vpack.c.bf16 %v2670_v28, %v2669_v27 }
0x10b1   :  { %v2785_v37 = vmul.f32 -1.442695, %v4172_v35 }
0x10b2   :  { %4225 = vpow2.f32 %v2784_v21 }
0x10b3   :  { %4227 = vpow2.f32 %v2785_v37 }
0x10bc   :  { %v4226_v2 = vpop.eup %4225 }
0x10bd   :  { %v4228_v38 = vpop.eup %4227  ;;  %v2540_v39 = vadd.f32 1.0, %v4226_v2 }
0x10be   :  { %v2541_v40 = vadd.f32 1.0, %v4228_v38  ;;  %v2653_v38 = vld [vmem:[#allocation5 + $0x858] sm:$0xff] }
0x10bf   :  { %4229 = vrcp.f32 %v2540_v39  ;;  %v2654_v39 = vld [vmem:[#allocation5 + $0x860] sm:$0xff] }
0x10c0   :  { %4231 = vrcp.f32 %v2541_v40  ;;  %v4167_v40 = vpack.c.bf16 %v2654_v39, %v2653_v38 }
0x10c9   :  { %v4230_v8 = vpop.eup %4229 }
0x10ca   :  { %v4232_v41 = vpop.eup %4231  ;;  %v4600_v16 = vmul.f32 %v4230_v8, %v4588_v36  ;;  %v2655_v36 = vld [vmem:[#allocation5 + $0x868] sm:$0xff] }
0x10cb   :  { %v4603_v11 = vmul.f32 %v4232_v41, %v4585_v33  ;;  %v4137_v33 = vpack.c.bf16 %v2656_v49, %v2655_v36 }
0x10cd   :  { %v2552_v42 = vadd.f32 %v4603_v11, %v4600_v16  ;;  %v2549_v44 = vmax.f32 %v4600_v16, %v4603_v11 }
0x10cf   :  { %2553 = vadd.xlane.f32.xlu1 %v2552_v42  ;;  %2550 = vmax.xlane.f32.xlu0 %v2549_v44 }
0x115c   :  { %v2554_v45 = vpop.xlane.xlu1 %2553  ;;  %v2551_v48 = vpop.xlane.xlu0 %2550 }
0x115d   :  { %v2555_v47 = vmul.f32 0.00390625, %v2554_v45 }
0x115f   :  { %v4135_v46 = vpack.c.bf16 %v2555_v47, %v2551_v48  ;;  %v2787_v47 = vld [vmem:[#allocation5 + $0x8e8] ss:$0 sm:$0xff] }
0x1161   :  { %4136 = vmatpush3.bf16.msra.mxu1 %v4135_v46 }
0x1162   :  { %4138 = vmatprep.subr.bf16.mxu1 %v4137_v33 }
0x1164   :  { %3623 = vmatmul.mubr.f32.vlgmr.msra.gmra.mrb[16].mxu1 %v2548_v30 }
0x1165   :  { %4140 = vmatpush3.bf16.msra.mxu1 %v4139_v53 }
0x1166   :  { %4142 = vmatprep.subr.bf16.mxu1 %v4141_v54 }
0x1169   :  { %4144 = vmatpush3.bf16.msra.mxu1 %v4143_v59 }
0x116a   :  { %4146 = vmatprep.subr.bf16.mxu1 %v4145_v34 }
0x116d   :  { %4148 = vmatpush3.bf16.msra.mxu1 %v4147_v63 }
0x116e   :  { %4150 = vmatprep.subr.bf16.mxu1 %v4149_v0 }
0x1171   :  { %4152 = vmatpush3.bf16.msra.mxu1 %v4151_v22 }
0x1172   :  { %4154 = vmatprep.subr.bf16.mxu1 %v4153_v6 }
0x1175   :  { %4156 = vmatpush3.bf16.msra.mxu1 %v4155_v9 }
0x1176   :  { %4158 = vmatprep.subr.bf16.mxu1 %v4157_v12 }
0x1179   :  { %4160 = vmatpush3.bf16.msra.mxu1 %v4159_v19 }
0x117a   :  { %4162 = vmatprep.subr.bf16.mxu1 %v4161_v10 }
0x117d   :  { %4164 = vmatpush3.bf16.msra.mxu1 %v4163_v29 }
0x117e   :  { %4166 = vmatprep.subr.bf16.mxu1 %v4165_v31 }
0x1181   :  { %4168 = vmatpush3.bf16.msra.mxu1 %v4167_v40 }
0x1237   :  { %v2622_v20 = vpop.f32.mrb[16].mxu1 }
0x1238   :  { %v2786_v35 = vmul.f32 -1.442695, %v2622_v20  ;;  %v3624_v21 = vpop.f32.mrb[17].mxu1 }
0x123a   :  { %4233 = vpow2.f32 %v2786_v35 }
0x1244   :  { %v4234_v37 = vpop.eup %4233 }
0x1245   :  { %v2629_v2 = vadd.f32 1.0, %v4234_v37 }
0x1247   :  { %4235 = vrcp.f32 %v2629_v2 }
0x1251   :  { %v4236_v8 = vpop.eup %4235 }
0x1252   :  { %2634 = vperm.xlu1 %4192, %v4236_v8  }
0x12d1   :  { %v2635_v41 = vpop.permute.xlu1 %2634 }
0x12d2   :  { %v2637_v42 = vmul.f32 %v2635_v41, %v4600_v16  ;;  %v2638_v44 = vmul.f32 %v2635_v41, %v4603_v11 }
0x12d4   :  { %2740 = vmatprep.mubr.f32.mxu1 %v2638_v44 }
0x12d5   :  { %2741 = vmatmul.mubr.f32.vlgmr.msra.gmra.mrb[18].mxu1 %v2637_v42 }
0x13a8   :  { %v3111_v45 = vpop.f32.mrb[18].mxu1 }
0x13a9   :  { %v3112_v48 = vpop.f32.mrb[19].mxu1 }
0x13aa   :  { %v3113_v46 = vadd.f32 %v3112_v48, %v3111_v45 }
0x13ac   :  { %v2743_v30 = vadd.f32 %v3113_v46, %v2787_v47 }
0x13ae   :  { %vm2746_vm5 = vcmp.ge.f32.partialorder %v2743_v30, 0.0  ;;  %v2747_v36 = vmul.f32 0.01, %v2743_v30 }
0x13b0   :  { %v2748_v49 = vsel %vm2746_vm5, %v2743_v30, %v2747_v36 }
0x13b1   :  { %2749 = vst [vmem:[%s4621_s7] sm:$0xff] %v2748_v49 }
0x13b2   :  { %2754 = vsyncpa [#allocation4], 1 }
0x13b3   :  { %2755 = vsyncpa [#allocation6], 1 }

</bundles_post_ra>
